<compile_context>
chip_gen: v7x
topology: tpu7x:2x2x1
jax: 0.10.0
libtpu: 0.0.40
codegen_flags: <defaults>
</compile_context>

<pallas_src>
import math
from functools import partial

import jax
import jax.numpy as jnp
from jax import lax
from jax.experimental import pallas as pl
from jax.experimental.pallas import tpu as pltpu

LN_EPS = 1e-6


# ----------------------------- in-kernel helpers -----------------------------

def _layernorm(z, gamma, beta):
    """torch-style LayerNorm: unbiased std (d-1), eps added to std."""
    d = z.shape[-1]
    mean = jnp.mean(z, axis=-1, keepdims=True)
    var = jnp.sum((z - mean) ** 2, axis=-1, keepdims=True) * (1.0 / (d - 1))
    inv = pl.reciprocal(jnp.sqrt(var) + LN_EPS, approx=False)
    return gamma * ((z - mean) * inv) + beta


# --------------------------------- kernel ------------------------------------

def _encoder_kernel(n_heads, inv_scale, B, S,
                    x_ref, pos_ref, mask_ref,
                    wqkv_ref, wo_ref, g1_ref, be1_ref,
                    w1_ref, bb1_ref, w2_ref, bb2_ref, g2_ref, be2_ref,
                    o_ref, h_ref):
    """One grid step == one encoder layer; activation carried in h_ref (VMEM)."""
    D = x_ref.shape[-1]
    hd = D // n_heads

    # Layer 0: initialize the carried activation with x + positional encodings
    # (dropout is identity at inference), then apply the padding mask.
    @pl.when(pl.program_id(0) == 0)
    def _():
        h_ref[...] = (x_ref[...].astype(jnp.float32) + pos_ref[...]) * mask_ref[...]

    h = h_ref[...]                                             # (B*S, D) f32

    # ---- fused QKV projection: one MXU pass with N = 3D ----------------------
    qkv = jnp.dot(h, wqkv_ref[0], preferred_element_type=jnp.float32)  # (BS, 3D)
    wo = wo_ref[0]                                             # (D, D)

    # ---- multi-head self-attention + Wo + residual ----------------------------
    # concat(heads) @ Wo  ==  sum_h head_h @ Wo[h*hd:(h+1)*hd, :]  -> no lane
    # concat.  B and n_heads are tiny statics, so the loops are fully unrolled.
    z_rows = []
    for b in range(B):
        r0 = b * S
        q = qkv[r0:r0 + S, 0:D]
        k = qkv[r0:r0 + S, D:2 * D]
        v = qkv[r0:r0 + S, 2 * D:3 * D]
        zb = h[r0:r0 + S, :]                                   # residual rows
        for hh in range(n_heads):
            lo = hh * hd
            hi = lo + hd
            # scores = q_h @ k_h^T  (contract last dims; avoids a transpose)
            s = lax.dot_general(q[:, lo:hi], k[:, lo:hi],
                                (((1,), (1,)), ((), ())),
                                preferred_element_type=jnp.float32) * inv_scale
            s = s - jnp.max(s, axis=-1, keepdims=True)
            p = jnp.exp(s)
            p = p * pl.reciprocal(jnp.sum(p, axis=-1, keepdims=True), approx=True)
            oh = jnp.dot(p, v[:, lo:hi], preferred_element_type=jnp.float32)
            zb = zb + jnp.dot(oh, wo[lo:hi, :], preferred_element_type=jnp.float32)
        z_rows.append(zb)
    z = jnp.concatenate(z_rows, axis=0) if B > 1 else z_rows[0]   # (BS, D)

    y = _layernorm(z, g1_ref[0], be1_ref[0])

    # ---- feed-forward + residual + LN2 ----------------------------------------
    ff = jnp.dot(y, w1_ref[0], preferred_element_type=jnp.float32) + bb1_ref[0]
    ff = jnp.maximum(ff, 0.0)
    ff = jnp.dot(ff, w2_ref[0], preferred_element_type=jnp.float32) + bb2_ref[0]
    hn = _layernorm(y + ff, g2_ref[0], be2_ref[0]) * mask_ref[...]

    h_ref[...] = hn                                            # carry to layer l+1
    o_ref[0] = hn.astype(o_ref.dtype)                          # per-layer encoding


# -------------------------------- wrappers ------------------------------------

def positional_encodings(seq_len, d_model):
    """Matches positional_encodings_like: sin on even, cos on odd channels."""
    pos = jnp.arange(seq_len, dtype=jnp.float32)[:, None]          # (S, 1)
    ch = jnp.arange(d_model)
    exponent = jnp.where(ch % 2 == 0, ch, ch - 1).astype(jnp.float32) / d_model
    angles = pos / (10000.0 ** exponent)[None, :]                  # (S, D)
    return jnp.where((ch % 2 == 0)[None, :], jnp.sin(angles), jnp.cos(angles))


def encoder_forward(x, params, *, n_heads, mask=None):
    """Pallas implementation of Encoder.forward; returns list of per-layer outputs."""
    B, S, D = x.shape
    BS = B * S
    layers = params["layers"]
    L = len(layers)
    Dh = layers[0]["w1"].shape[1]

    pos_bs = jnp.broadcast_to(positional_encodings(S, D)[None], (B, S, D)
                              ).reshape(BS, D).astype(jnp.float32)
    if mask is None:
        mask_bs = jnp.ones((BS, D), jnp.float32)
    else:
        mask_bs = jnp.broadcast_to(mask.astype(jnp.float32), (B, S, D)).reshape(BS, D)

    # Stack per-layer weights along a leading axis so a single pallas_call with
    # grid=(L,) pipelines the weight DMAs behind the previous layer's compute.
    def stack(name):
        return jnp.stack([lp[name] for lp in layers])

    wqkv = jnp.stack([jnp.concatenate([lp["wq"], lp["wk"], lp["wv"]], axis=1)
                      for lp in layers])                         # (L, D, 3D)
    wo = stack("wo")                                             # (L, D, D)
    g1 = stack("ln1_g").reshape(L, 1, D)
    be1 = stack("ln1_b").reshape(L, 1, D)
    w1 = stack("w1")                                             # (L, D, Dh)
    bb1 = stack("b1").reshape(L, 1, Dh)
    w2 = stack("w2")                                             # (L, Dh, D)
    bb2 = stack("b2").reshape(L, 1, D)
    g2 = stack("ln2_g").reshape(L, 1, D)
    be2 = stack("ln2_b").reshape(L, 1, D)

    inv_scale = 1.0 / math.sqrt(D)      # reference scales by sqrt(d_model)
    kernel = partial(_encoder_kernel, n_heads, inv_scale, B, S)

    act_spec = pl.BlockSpec((BS, D), lambda l: (0, 0))           # DMA'd once

    def wspec(a, b):
        return pl.BlockSpec((1, a, b), lambda l: (l, 0, 0))      # per-layer slab

    # Advisory cost estimate so XLA schedules around the fused custom call.
    flops = L * (2 * BS * D * 3 * D          # QKV projection
                 + 4 * B * S * S * D         # scores + PV over all heads
                 + 2 * BS * D * D            # Wo
                 + 4 * BS * D * Dh)          # FFN
    transcendentals = L * (B * n_heads * S * S + 4 * BS)
    bytes_accessed = 4 * (3 * BS * D + L * BS * D
                          + wqkv.size + wo.size + w1.size + w2.size
                          + 6 * L * D + L * Dh)

    out = pl.pallas_call(
        kernel,
        out_shape=jax.ShapeDtypeStruct((L, BS, D), x.dtype),
        grid_spec=pltpu.PrefetchScalarGridSpec(
            num_scalar_prefetch=0,
            grid=(L,),
            in_specs=[act_spec, act_spec, act_spec,
                      wspec(D, 3 * D), wspec(D, D), wspec(1, D), wspec(1, D),
                      wspec(D, Dh), wspec(1, Dh), wspec(Dh, D), wspec(1, D),
                      wspec(1, D), wspec(1, D)],
            out_specs=pl.BlockSpec((1, BS, D), lambda l: (l, 0, 0)),
            scratch_shapes=[pltpu.VMEM((BS, D), jnp.float32)],   # carried activation
        ),
        # Layer axis carries state -> "arbitrary".  For production sizes add a
        # leading row-tile axis marked parallel / core-parallel (v7x megacore).
        compiler_params=pltpu.CompilerParams(dimension_semantics=("arbitrary",)),
        cost_estimate=pl.CostEstimate(flops=flops,
                                      transcendentals=transcendentals,
                                      bytes_accessed=bytes_accessed),
    )(x.reshape(BS, D), pos_bs, mask_bs,
      wqkv, wo, g1, be1, w1, bb1, w2, bb2, g2, be2)

    # TODO(synk): training-mode dropout (RNG masks) not implemented (eval mode).
    return [out[l].reshape(B, S, D) for l in range(L)]


# --------------------------- pure-JAX reference -------------------------------

def _layernorm_ref(z, gamma, beta):
    d = z.shape[-1]
    mean = jnp.mean(z, axis=-1, keepdims=True)
    std = jnp.sqrt(jnp.sum((z - mean) ** 2, axis=-1, keepdims=True) / (d - 1))
    return gamma * (z - mean) / (std + LN_EPS) + beta


def encoder_reference(x, params, *, n_heads, mask=None):
    hp = jax.lax.Precision.HIGHEST
    B, S, D = x.shape
    hd = D // n_heads
    scale = math.sqrt(D)
    h = x + positional_encodings(S, D)[None]
    if mask is not None:
        h = h * mask
    outs = []
    for lp in params["layers"]:
        q = jnp.einsum("bsd,de->bse", h, lp["wq"], precision=hp)
        k = jnp.einsum("bsd,de->bse", h, lp["wk"], precision=hp)
        v = jnp.einsum("bsd,de->bse", h, lp["wv"], precision=hp)
        heads = []
        for i in range(n_heads):
            sl = slice(i * hd, (i + 1) * hd)
            s = jnp.einsum("bqd,bkd->bqk", q[..., sl], k[..., sl], precision=hp) / scale
            p = jax.nn.softmax(s, axis=-1)
            heads.append(jnp.einsum("bqk,bkd->bqd", p, v[..., sl], precision=hp))
        attn = jnp.concatenate(heads, axis=-1)
        z = h + jnp.einsum("bsd,de->bse", attn, lp["wo"], precision=hp)
        y = _layernorm_ref(z, lp["ln1_g"], lp["ln1_b"])
        ff = jnp.maximum(jnp.einsum("bsd,dh->bsh", y, lp["w1"], precision=hp) + lp["b1"], 0.0)
        ff = jnp.einsum("bsh,hd->bsd", ff, lp["w2"], precision=hp) + lp["b2"]
        hn = _layernorm_ref(y + ff, lp["ln2_g"], lp["ln2_b"])
        if mask is not None:
            hn = hn * mask
        h = hn
        outs.append(h)
    return outs


# ---------------------------------- main --------------------------------------

def init_params(key, d_model, d_hidden, n_layers):
    """Weights stored as (in, out), i.e. pre-transposed relative to torch Linear."""
    def w(k, fi, fo):
        return jax.random.normal(k, (fi, fo), jnp.float32) / math.sqrt(fi)

    layers = []
    for _ in range(n_layers):
        key, *ks = jax.random.split(key, 8)
        layers.append(dict(
            wq=w(ks[0], d_model, d_model),
            wk=w(ks[1], d_model, d_model),
            wv=w(ks[2], d_model, d_model),
            wo=w(ks[3], d_model, d_model),
            ln1_g=jnp.ones((d_model,), jnp.float32),
            ln1_b=jnp.zeros((d_model,), jnp.float32),
            w1=w(ks[4], d_model, d_hidden),
            b1=0.1 * jax.random.normal(ks[5], (d_hidden,), jnp.float32),
            w2=w(ks[6], d_hidden, d_model),
            b2=jnp.zeros((d_model,), jnp.float32),
            ln2_g=jnp.ones((d_model,), jnp.float32),
            ln2_b=jnp.zeros((d_model,), jnp.float32),
        ))
    return {"layers": layers}, key


if __name__ == "__main__":
    # Encoder(d_model=32, d_hidden=64, n_vocab=100, n_layers=2, n_heads=4, drop_ratio=0.0)
    d_model, d_hidden, n_layers, n_heads = 32, 64, 2, 4
    batch, seq = 2, 8

    key = jax.random.PRNGKey(0)
    params, key = init_params(key, d_model, d_hidden, n_layers)
    key, kx, km = jax.random.split(key, 3)
    x = jax.random.normal(kx, (batch, seq, d_model), jnp.float32)

    # tolerance absorbs MXU-vs-XLA f32 matmul rounding + approx EUP reciprocal
    TOL = 3e-3

    # ---- unmasked path ----
    outs = jax.block_until_ready(encoder_forward(x, params, n_heads=n_heads))
    refs = encoder_reference(x, params, n_heads=n_heads)
    assert len(outs) == n_layers
    for o, r in zip(outs, refs):
        assert o.shape == (batch, seq, d_model)
        max_diff = float(jnp.max(jnp.abs(o - r)))
        assert jnp.allclose(o, r, atol=TOL, rtol=TOL), f"mismatch, max diff {max_diff}"

    # ---- masked path (padding mask of shape (B, S, 1)) ----
    mask = (jax.random.uniform(km, (batch, seq, 1)) > 0.3).astype(jnp.float32)
    outs_m = jax.block_until_ready(
        encoder_forward(x, params, n_heads=n_heads, mask=mask))
    refs_m = encoder_reference(x, params, n_heads=n_heads, mask=mask)
    for o, r in zip(outs_m, refs_m):
        max_diff = float(jnp.max(jnp.abs(o - r)))
        assert jnp.allclose(o, r, atol=TOL, rtol=TOL), f"masked mismatch, max diff {max_diff}"

    print("KERNEL_OK")
</pallas_src>

<mosaic_0001>
module attributes {stable_mosaic.version = 11 : i64} {
  func.func @_encoder_kernel(%arg0: i32, %arg1: memref<16x32xf32, #tpu.memory_space<vmem>>, %arg2: memref<16x32xf32, #tpu.memory_space<vmem>>, %arg3: memref<16x32xf32, #tpu.memory_space<vmem>>, %arg4: memref<1x32x96xf32, #tpu.memory_space<vmem>>, %arg5: memref<1x32x32xf32, #tpu.memory_space<vmem>>, %arg6: memref<1x1x32xf32, #tpu.memory_space<vmem>>, %arg7: memref<1x1x32xf32, #tpu.memory_space<vmem>>, %arg8: memref<1x32x64xf32, #tpu.memory_space<vmem>>, %arg9: memref<1x1x64xf32, #tpu.memory_space<vmem>>, %arg10: memref<1x64x32xf32, #tpu.memory_space<vmem>>, %arg11: memref<1x1x32xf32, #tpu.memory_space<vmem>>, %arg12: memref<1x1x32xf32, #tpu.memory_space<vmem>>, %arg13: memref<1x1x32xf32, #tpu.memory_space<vmem>>, %arg14: memref<1x16x32xf32, #tpu.memory_space<vmem>>, %arg15: memref<16x32xf32, #tpu.memory_space<vmem>>) attributes {dimension_semantics = [#tpu.dimension_semantics<arbitrary>], iteration_bounds = array<i64: 2>, scalar_prefetch = 0 : i64, scratch_operands = 1 : i64, tpu.core_type = #tpu.core_type<tc>, window_params = [{pipeline_mode = #tpu.pipeline_mode<synchronous>, transform_indices = @transform_0, window_bounds = array<i64: 16, 32>}, {pipeline_mode = #tpu.pipeline_mode<synchronous>, transform_indices = @transform_1, window_bounds = array<i64: 16, 32>}, {pipeline_mode = #tpu.pipeline_mode<synchronous>, transform_indices = @transform_2, window_bounds = array<i64: 16, 32>}, {transform_indices = @transform_3, window_bounds = array<i64: 1, 32, 96>}, {transform_indices = @transform_4, window_bounds = array<i64: 1, 32, 32>}, {transform_indices = @transform_5, window_bounds = array<i64: 1, 1, 32>}, {transform_indices = @transform_6, window_bounds = array<i64: 1, 1, 32>}, {transform_indices = @transform_7, window_bounds = array<i64: 1, 32, 64>}, {transform_indices = @transform_8, window_bounds = array<i64: 1, 1, 64>}, {transform_indices = @transform_9, window_bounds = array<i64: 1, 64, 32>}, {transform_indices = @transform_10, window_bounds = array<i64: 1, 1, 32>}, {transform_indices = @transform_11, window_bounds = array<i64: 1, 1, 32>}, {transform_indices = @transform_12, window_bounds = array<i64: 1, 1, 32>}, {transform_indices = @transform_13, window_bounds = array<i64: 1, 16, 32>}]} {
    %c0_i32 = arith.constant 0 : i32
    %0 = arith.cmpi eq, %arg0, %c0_i32 : i32
    %1 = arith.extui %0 : i1 to i32
    %c0_i32_0 = arith.constant 0 : i32
    %2 = arith.cmpi ne, %1, %c0_i32_0 : i32
    scf.if %2 {
      %c0_100 = arith.constant 0 : index
      %c0_101 = arith.constant 0 : index
      %255 = vector.load %arg1[%c0_100, %c0_101] : memref<16x32xf32, #tpu.memory_space<vmem>>, vector<16x32xf32>
      %c0_102 = arith.constant 0 : index
      %c0_103 = arith.constant 0 : index
      %256 = vector.load %arg2[%c0_102, %c0_103] : memref<16x32xf32, #tpu.memory_space<vmem>>, vector<16x32xf32>
      %257 = arith.addf %255, %256 : vector<16x32xf32>
      %c0_104 = arith.constant 0 : index
      %c0_105 = arith.constant 0 : index
      %258 = vector.load %arg3[%c0_104, %c0_105] : memref<16x32xf32, #tpu.memory_space<vmem>>, vector<16x32xf32>
      %259 = arith.mulf %257, %258 : vector<16x32xf32>
      %c0_106 = arith.constant 0 : index
      %c0_107 = arith.constant 0 : index
      %260 = vector.load %arg15[%c0_106, %c0_107] : memref<16x32xf32, #tpu.memory_space<vmem>>, vector<16x32xf32>
      tpu.vector_store %arg15[%c0_106, %c0_107], %259 {strides = array<i32>} : memref<16x32xf32, #tpu.memory_space<vmem>>, vector<16x32xf32>,
    } else {
    }
    %c0 = arith.constant 0 : index
    %c0_1 = arith.constant 0 : index
    %3 = vector.load %arg15[%c0, %c0_1] : memref<16x32xf32, #tpu.memory_space<vmem>>, vector<16x32xf32>
    %c0_2 = arith.constant 0 : index
    %c0_3 = arith.constant 0 : index
    %c0_4 = arith.constant 0 : index
    %4 = vector.load %arg4[%c0_2, %c0_3, %c0_4] : memref<1x32x96xf32, #tpu.memory_space<vmem>>, vector<1x32x96xf32>
    %5 = vector.shape_cast %4 : vector<1x32x96xf32> to vector<32x96xf32>
    %cst = arith.constant dense<0.000000e+00> : vector<16x96xf32>
    %6 = tpu.matmul %3, %5, %cst {dimension_numbers = #tpu.dot_dimension_numbers<[1], [0], [0], [1], [0, 0, 1, 1], [], []>} : vector<16x32xf32>, vector<32x96xf32>, vector<16x96xf32> -> vector<16x96xf32>
    %c0_5 = arith.constant 0 : index
    %c0_6 = arith.constant 0 : index
    %c0_7 = arith.constant 0 : index
    %7 = vector.load %arg5[%c0_5, %c0_6, %c0_7] : memref<1x32x32xf32, #tpu.memory_space<vmem>>, vector<1x32x32xf32>
    %8 = vector.shape_cast %7 : vector<1x32x32xf32> to vector<32x32xf32>
    %9 = vector.extract_strided_slice %6 {offsets = [0, 0], sizes = [8, 32], strides = [1, 1]} : vector<16x96xf32> to vector<8x32xf32>
    %10 = vector.extract_strided_slice %6 {offsets = [0, 32], sizes = [8, 32], strides = [1, 1]} : vector<16x96xf32> to vector<8x32xf32>
    %11 = vector.extract_strided_slice %6 {offsets = [0, 64], sizes = [8, 32], strides = [1, 1]} : vector<16x96xf32> to vector<8x32xf32>
    %12 = vector.extract_strided_slice %3 {offsets = [0, 0], sizes = [8, 32], strides = [1, 1]} : vector<16x32xf32> to vector<8x32xf32>
    %13 = vector.extract_strided_slice %9 {offsets = [0, 0], sizes = [8, 8], strides = [1, 1]} : vector<8x32xf32> to vector<8x8xf32>
    %14 = vector.extract_strided_slice %10 {offsets = [0, 0], sizes = [8, 8], strides = [1, 1]} : vector<8x32xf32> to vector<8x8xf32>
    %cst_8 = arith.constant dense<0.000000e+00> : vector<8x8xf32>
    %15 = tpu.matmul %13, %14, %cst_8 {dimension_numbers = #tpu.dot_dimension_numbers<[1], [1], [0], [0], [0, 0, 1, 0], [], []>} : vector<8x8xf32>, vector<8x8xf32>, vector<8x8xf32> -> vector<8x8xf32>
    %cst_9 = arith.constant 0.176776692 : f32
    %16 = vector.broadcast %cst_9 : f32 to vector<8x8xf32>
    %17 = arith.mulf %15, %16 : vector<8x8xf32>
    %cst_10 = arith.constant dense<0xFF800000> : vector<8xf32>
    %18 = vector.multi_reduction <maximumf>, %17, %cst_10 [1] : vector<8x8xf32> to vector<8xf32>
    %19 = vector.shape_cast %18 : vector<8xf32> to vector<8x1xf32>
    %20 = vector.broadcast %19 : vector<8x1xf32> to vector<8x8xf32>
    %21 = arith.subf %17, %20 : vector<8x8xf32>
    %22 = math.exp %21 : vector<8x8xf32>
    %cst_11 = arith.constant dense<0.000000e+00> : vector<8xf32>
    %23 = vector.multi_reduction <add>, %22, %cst_11 [1] : vector<8x8xf32> to vector<8xf32>
    %24 = vector.shape_cast %23 : vector<8xf32> to vector<8x1xf32>
    %25 = tpu.reciprocal %24 {approx = true} : vector<8x1xf32> -> vector<8x1xf32>
    %26 = vector.broadcast %25 : vector<8x1xf32> to vector<8x8xf32>
    %27 = arith.mulf %22, %26 : vector<8x8xf32>
    %28 = vector.extract_strided_slice %11 {offsets = [0, 0], sizes = [8, 8], strides = [1, 1]} : vector<8x32xf32> to vector<8x8xf32>
    %cst_12 = arith.constant dense<0.000000e+00> : vector<8x8xf32>
    %29 = tpu.matmul %27, %28, %cst_12 {dimension_numbers = #tpu.dot_dimension_numbers<[1], [0], [0], [1], [0, 0, 1, 1], [], []>} : vector<8x8xf32>, vector<8x8xf32>, vector<8x8xf32> -> vector<8x8xf32>
    %30 = vector.extract_strided_slice %8 {offsets = [0, 0], sizes = [8, 32], strides = [1, 1]} : vector<32x32xf32> to vector<8x32xf32>
    %cst_13 = arith.constant dense<0.000000e+00> : vector<8x32xf32>
    %31 = tpu.matmul %29, %30, %cst_13 {dimension_numbers = #tpu.dot_dimension_numbers<[1], [0], [0], [1], [0, 0, 1, 1], [], []>} : vector<8x8xf32>, vector<8x32xf32>, vector<8x32xf32> -> vector<8x32xf32>
    %32 = arith.addf %12, %31 : vector<8x32xf32>
    %33 = vector.extract_strided_slice %9 {offsets = [0, 8], sizes = [8, 8], strides = [1, 1]} : vector<8x32xf32> to vector<8x8xf32>
    %34 = vector.extract_strided_slice %10 {offsets = [0, 8], sizes = [8, 8], strides = [1, 1]} : vector<8x32xf32> to vector<8x8xf32>
    %cst_14 = arith.constant dense<0.000000e+00> : vector<8x8xf32>
    %35 = tpu.matmul %33, %34, %cst_14 {dimension_numbers = #tpu.dot_dimension_numbers<[1], [1], [0], [0], [0, 0, 1, 0], [], []>} : vector<8x8xf32>, vector<8x8xf32>, vector<8x8xf32> -> vector<8x8xf32>
    %cst_15 = arith.constant 0.176776692 : f32
    %36 = vector.broadcast %cst_15 : f32 to vector<8x8xf32>
    %37 = arith.mulf %35, %36 : vector<8x8xf32>
    %cst_16 = arith.constant dense<0xFF800000> : vector<8xf32>
    %38 = vector.multi_reduction <maximumf>, %37, %cst_16 [1] : vector<8x8xf32> to vector<8xf32>
    %39 = vector.shape_cast %38 : vector<8xf32> to vector<8x1xf32>
    %40 = vector.broadcast %39 : vector<8x1xf32> to vector<8x8xf32>
    %41 = arith.subf %37, %40 : vector<8x8xf32>
    %42 = math.exp %41 : vector<8x8xf32>
    %cst_17 = arith.constant dense<0.000000e+00> : vector<8xf32>
    %43 = vector.multi_reduction <add>, %42, %cst_17 [1] : vector<8x8xf32> to vector<8xf32>
    %44 = vector.shape_cast %43 : vector<8xf32> to vector<8x1xf32>
    %45 = tpu.reciprocal %44 {approx = true} : vector<8x1xf32> -> vector<8x1xf32>
    %46 = vector.broadcast %45 : vector<8x1xf32> to vector<8x8xf32>
    %47 = arith.mulf %42, %46 : vector<8x8xf32>
    %48 = vector.extract_strided_slice %11 {offsets = [0, 8], sizes = [8, 8], strides = [1, 1]} : vector<8x32xf32> to vector<8x8xf32>
    %cst_18 = arith.constant dense<0.000000e+00> : vector<8x8xf32>
    %49 = tpu.matmul %47, %48, %cst_18 {dimension_numbers = #tpu.dot_dimension_numbers<[1], [0], [0], [1], [0, 0, 1, 1], [], []>} : vector<8x8xf32>, vector<8x8xf32>, vector<8x8xf32> -> vector<8x8xf32>
    %50 = vector.extract_strided_slice %8 {offsets = [8, 0], sizes = [8, 32], strides = [1, 1]} : vector<32x32xf32> to vector<8x32xf32>
    %cst_19 = arith.constant dense<0.000000e+00> : vector<8x32xf32>
    %51 = tpu.matmul %49, %50, %cst_19 {dimension_numbers = #tpu.dot_dimension_numbers<[1], [0], [0], [1], [0, 0, 1, 1], [], []>} : vector<8x8xf32>, vector<8x32xf32>, vector<8x32xf32> -> vector<8x32xf32>
    %52 = arith.addf %32, %51 : vector<8x32xf32>
    %53 = vector.extract_strided_slice %9 {offsets = [0, 16], sizes = [8, 8], strides = [1, 1]} : vector<8x32xf32> to vector<8x8xf32>
    %54 = vector.extract_strided_slice %10 {offsets = [0, 16], sizes = [8, 8], strides = [1, 1]} : vector<8x32xf32> to vector<8x8xf32>
    %cst_20 = arith.constant dense<0.000000e+00> : vector<8x8xf32>
    %55 = tpu.matmul %53, %54, %cst_20 {dimension_numbers = #tpu.dot_dimension_numbers<[1], [1], [0], [0], [0, 0, 1, 0], [], []>} : vector<8x8xf32>, vector<8x8xf32>, vector<8x8xf32> -> vector<8x8xf32>
    %cst_21 = arith.constant 0.176776692 : f32
    %56 = vector.broadcast %cst_21 : f32 to vector<8x8xf32>
    %57 = arith.mulf %55, %56 : vector<8x8xf32>
    %cst_22 = arith.constant dense<0xFF800000> : vector<8xf32>
    %58 = vector.multi_reduction <maximumf>, %57, %cst_22 [1] : vector<8x8xf32> to vector<8xf32>
    %59 = vector.shape_cast %58 : vector<8xf32> to vector<8x1xf32>
    %60 = vector.broadcast %59 : vector<8x1xf32> to vector<8x8xf32>
    %61 = arith.subf %57, %60 : vector<8x8xf32>
    %62 = math.exp %61 : vector<8x8xf32>
    %cst_23 = arith.constant dense<0.000000e+00> : vector<8xf32>
    %63 = vector.multi_reduction <add>, %62, %cst_23 [1] : vector<8x8xf32> to vector<8xf32>
    %64 = vector.shape_cast %63 : vector<8xf32> to vector<8x1xf32>
    %65 = tpu.reciprocal %64 {approx = true} : vector<8x1xf32> -> vector<8x1xf32>
    %66 = vector.broadcast %65 : vector<8x1xf32> to vector<8x8xf32>
    %67 = arith.mulf %62, %66 : vector<8x8xf32>
    %68 = vector.extract_strided_slice %11 {offsets = [0, 16], sizes = [8, 8], strides = [1, 1]} : vector<8x32xf32> to vector<8x8xf32>
    %cst_24 = arith.constant dense<0.000000e+00> : vector<8x8xf32>
    %69 = tpu.matmul %67, %68, %cst_24 {dimension_numbers = #tpu.dot_dimension_numbers<[1], [0], [0], [1], [0, 0, 1, 1], [], []>} : vector<8x8xf32>, vector<8x8xf32>, vector<8x8xf32> -> vector<8x8xf32>
    %70 = vector.extract_strided_slice %8 {offsets = [16, 0], sizes = [8, 32], strides = [1, 1]} : vector<32x32xf32> to vector<8x32xf32>
    %cst_25 = arith.constant dense<0.000000e+00> : vector<8x32xf32>
    %71 = tpu.matmul %69, %70, %cst_25 {dimension_numbers = #tpu.dot_dimension_numbers<[1], [0], [0], [1], [0, 0, 1, 1], [], []>} : vector<8x8xf32>, vector<8x32xf32>, vector<8x32xf32> -> vector<8x32xf32>
    %72 = arith.addf %52, %71 : vector<8x32xf32>
    %73 = vector.extract_strided_slice %9 {offsets = [0, 24], sizes = [8, 8], strides = [1, 1]} : vector<8x32xf32> to vector<8x8xf32>
    %74 = vector.extract_strided_slice %10 {offsets = [0, 24], sizes = [8, 8], strides = [1, 1]} : vector<8x32xf32> to vector<8x8xf32>
    %cst_26 = arith.constant dense<0.000000e+00> : vector<8x8xf32>
    %75 = tpu.matmul %73, %74, %cst_26 {dimension_numbers = #tpu.dot_dimension_numbers<[1], [1], [0], [0], [0, 0, 1, 0], [], []>} : vector<8x8xf32>, vector<8x8xf32>, vector<8x8xf32> -> vector<8x8xf32>
    %cst_27 = arith.constant 0.176776692 : f32
    %76 = vector.broadcast %cst_27 : f32 to vector<8x8xf32>
    %77 = arith.mulf %75, %76 : vector<8x8xf32>
    %cst_28 = arith.constant dense<0xFF800000> : vector<8xf32>
    %78 = vector.multi_reduction <maximumf>, %77, %cst_28 [1] : vector<8x8xf32> to vector<8xf32>
    %79 = vector.shape_cast %78 : vector<8xf32> to vector<8x1xf32>
    %80 = vector.broadcast %79 : vector<8x1xf32> to vector<8x8xf32>
    %81 = arith.subf %77, %80 : vector<8x8xf32>
    %82 = math.exp %81 : vector<8x8xf32>
    %cst_29 = arith.constant dense<0.000000e+00> : vector<8xf32>
    %83 = vector.multi_reduction <add>, %82, %cst_29 [1] : vector<8x8xf32> to vector<8xf32>
    %84 = vector.shape_cast %83 : vector<8xf32> to vector<8x1xf32>
    %85 = tpu.reciprocal %84 {approx = true} : vector<8x1xf32> -> vector<8x1xf32>
    %86 = vector.broadcast %85 : vector<8x1xf32> to vector<8x8xf32>
    %87 = arith.mulf %82, %86 : vector<8x8xf32>
    %88 = vector.extract_strided_slice %11 {offsets = [0, 24], sizes = [8, 8], strides = [1, 1]} : vector<8x32xf32> to vector<8x8xf32>
    %cst_30 = arith.constant dense<0.000000e+00> : vector<8x8xf32>
    %89 = tpu.matmul %87, %88, %cst_30 {dimension_numbers = #tpu.dot_dimension_numbers<[1], [0], [0], [1], [0, 0, 1, 1], [], []>} : vector<8x8xf32>, vector<8x8xf32>, vector<8x8xf32> -> vector<8x8xf32>
    %90 = vector.extract_strided_slice %8 {offsets = [24, 0], sizes = [8, 32], strides = [1, 1]} : vector<32x32xf32> to vector<8x32xf32>
    %cst_31 = arith.constant dense<0.000000e+00> : vector<8x32xf32>
    %91 = tpu.matmul %89, %90, %cst_31 {dimension_numbers = #tpu.dot_dimension_numbers<[1], [0], [0], [1], [0, 0, 1, 1], [], []>} : vector<8x8xf32>, vector<8x32xf32>, vector<8x32xf32> -> vector<8x32xf32>
    %92 = arith.addf %72, %91 : vector<8x32xf32>
    %93 = vector.extract_strided_slice %6 {offsets = [8, 0], sizes = [8, 32], strides = [1, 1]} : vector<16x96xf32> to vector<8x32xf32>
    %94 = vector.extract_strided_slice %6 {offsets = [8, 32], sizes = [8, 32], strides = [1, 1]} : vector<16x96xf32> to vector<8x32xf32>
    %95 = vector.extract_strided_slice %6 {offsets = [8, 64], sizes = [8, 32], strides = [1, 1]} : vector<16x96xf32> to vector<8x32xf32>
    %96 = vector.extract_strided_slice %3 {offsets = [8, 0], sizes = [8, 32], strides = [1, 1]} : vector<16x32xf32> to vector<8x32xf32>
    %97 = vector.extract_strided_slice %93 {offsets = [0, 0], sizes = [8, 8], strides = [1, 1]} : vector<8x32xf32> to vector<8x8xf32>
    %98 = vector.extract_strided_slice %94 {offsets = [0, 0], sizes = [8, 8], strides = [1, 1]} : vector<8x32xf32> to vector<8x8xf32>
    %cst_32 = arith.constant dense<0.000000e+00> : vector<8x8xf32>
    %99 = tpu.matmul %97, %98, %cst_32 {dimension_numbers = #tpu.dot_dimension_numbers<[1], [1], [0], [0], [0, 0, 1, 0], [], []>} : vector<8x8xf32>, vector<8x8xf32>, vector<8x8xf32> -> vector<8x8xf32>
    %cst_33 = arith.constant 0.176776692 : f32
    %100 = vector.broadcast %cst_33 : f32 to vector<8x8xf32>
    %101 = arith.mulf %99, %100 : vector<8x8xf32>
    %cst_34 = arith.constant dense<0xFF800000> : vector<8xf32>
    %102 = vector.multi_reduction <maximumf>, %101, %cst_34 [1] : vector<8x8xf32> to vector<8xf32>
    %103 = vector.shape_cast %102 : vector<8xf32> to vector<8x1xf32>
    %104 = vector.broadcast %103 : vector<8x1xf32> to vector<8x8xf32>
    %105 = arith.subf %101, %104 : vector<8x8xf32>
    %106 = math.exp %105 : vector<8x8xf32>
    %cst_35 = arith.constant dense<0.000000e+00> : vector<8xf32>
    %107 = vector.multi_reduction <add>, %106, %cst_35 [1] : vector<8x8xf32> to vector<8xf32>
    %108 = vector.shape_cast %107 : vector<8xf32> to vector<8x1xf32>
    %109 = tpu.reciprocal %108 {approx = true} : vector<8x1xf32> -> vector<8x1xf32>
    %110 = vector.broadcast %109 : vector<8x1xf32> to vector<8x8xf32>
    %111 = arith.mulf %106, %110 : vector<8x8xf32>
    %112 = vector.extract_strided_slice %95 {offsets = [0, 0], sizes = [8, 8], strides = [1, 1]} : vector<8x32xf32> to vector<8x8xf32>
    %cst_36 = arith.constant dense<0.000000e+00> : vector<8x8xf32>
    %113 = tpu.matmul %111, %112, %cst_36 {dimension_numbers = #tpu.dot_dimension_numbers<[1], [0], [0], [1], [0, 0, 1, 1], [], []>} : vector<8x8xf32>, vector<8x8xf32>, vector<8x8xf32> -> vector<8x8xf32>
    %114 = vector.extract_strided_slice %8 {offsets = [0, 0], sizes = [8, 32], strides = [1, 1]} : vector<32x32xf32> to vector<8x32xf32>
    %cst_37 = arith.constant dense<0.000000e+00> : vector<8x32xf32>
    %115 = tpu.matmul %113, %114, %cst_37 {dimension_numbers = #tpu.dot_dimension_numbers<[1], [0], [0], [1], [0, 0, 1, 1], [], []>} : vector<8x8xf32>, vector<8x32xf32>, vector<8x32xf32> -> vector<8x32xf32>
    %116 = arith.addf %96, %115 : vector<8x32xf32>
    %117 = vector.extract_strided_slice %93 {offsets = [0, 8], sizes = [8, 8], strides = [1, 1]} : vector<8x32xf32> to vector<8x8xf32>
    %118 = vector.extract_strided_slice %94 {offsets = [0, 8], sizes = [8, 8], strides = [1, 1]} : vector<8x32xf32> to vector<8x8xf32>
    %cst_38 = arith.constant dense<0.000000e+00> : vector<8x8xf32>
    %119 = tpu.matmul %117, %118, %cst_38 {dimension_numbers = #tpu.dot_dimension_numbers<[1], [1], [0], [0], [0, 0, 1, 0], [], []>} : vector<8x8xf32>, vector<8x8xf32>, vector<8x8xf32> -> vector<8x8xf32>
    %cst_39 = arith.constant 0.176776692 : f32
    %120 = vector.broadcast %cst_39 : f32 to vector<8x8xf32>
    %121 = arith.mulf %119, %120 : vector<8x8xf32>
    %cst_40 = arith.constant dense<0xFF800000> : vector<8xf32>
    %122 = vector.multi_reduction <maximumf>, %121, %cst_40 [1] : vector<8x8xf32> to vector<8xf32>
    %123 = vector.shape_cast %122 : vector<8xf32> to vector<8x1xf32>
    %124 = vector.broadcast %123 : vector<8x1xf32> to vector<8x8xf32>
    %125 = arith.subf %121, %124 : vector<8x8xf32>
    %126 = math.exp %125 : vector<8x8xf32>
    %cst_41 = arith.constant dense<0.000000e+00> : vector<8xf32>
    %127 = vector.multi_reduction <add>, %126, %cst_41 [1] : vector<8x8xf32> to vector<8xf32>
    %128 = vector.shape_cast %127 : vector<8xf32> to vector<8x1xf32>
    %129 = tpu.reciprocal %128 {approx = true} : vector<8x1xf32> -> vector<8x1xf32>
    %130 = vector.broadcast %129 : vector<8x1xf32> to vector<8x8xf32>
    %131 = arith.mulf %126, %130 : vector<8x8xf32>
    %132 = vector.extract_strided_slice %95 {offsets = [0, 8], sizes = [8, 8], strides = [1, 1]} : vector<8x32xf32> to vector<8x8xf32>
    %cst_42 = arith.constant dense<0.000000e+00> : vector<8x8xf32>
    %133 = tpu.matmul %131, %132, %cst_42 {dimension_numbers = #tpu.dot_dimension_numbers<[1], [0], [0], [1], [0, 0, 1, 1], [], []>} : vector<8x8xf32>, vector<8x8xf32>, vector<8x8xf32> -> vector<8x8xf32>
    %134 = vector.extract_strided_slice %8 {offsets = [8, 0], sizes = [8, 32], strides = [1, 1]} : vector<32x32xf32> to vector<8x32xf32>
    %cst_43 = arith.constant dense<0.000000e+00> : vector<8x32xf32>
    %135 = tpu.matmul %133, %134, %cst_43 {dimension_numbers = #tpu.dot_dimension_numbers<[1], [0], [0], [1], [0, 0, 1, 1], [], []>} : vector<8x8xf32>, vector<8x32xf32>, vector<8x32xf32> -> vector<8x32xf32>
    %136 = arith.addf %116, %135 : vector<8x32xf32>
    %137 = vector.extract_strided_slice %93 {offsets = [0, 16], sizes = [8, 8], strides = [1, 1]} : vector<8x32xf32> to vector<8x8xf32>
    %138 = vector.extract_strided_slice %94 {offsets = [0, 16], sizes = [8, 8], strides = [1, 1]} : vector<8x32xf32> to vector<8x8xf32>
    %cst_44 = arith.constant dense<0.000000e+00> : vector<8x8xf32>
    %139 = tpu.matmul %137, %138, %cst_44 {dimension_numbers = #tpu.dot_dimension_numbers<[1], [1], [0], [0], [0, 0, 1, 0], [], []>} : vector<8x8xf32>, vector<8x8xf32>, vector<8x8xf32> -> vector<8x8xf32>
    %cst_45 = arith.constant 0.176776692 : f32
    %140 = vector.broadcast %cst_45 : f32 to vector<8x8xf32>
    %141 = arith.mulf %139, %140 : vector<8x8xf32>
    %cst_46 = arith.constant dense<0xFF800000> : vector<8xf32>
    %142 = vector.multi_reduction <maximumf>, %141, %cst_46 [1] : vector<8x8xf32> to vector<8xf32>
    %143 = vector.shape_cast %142 : vector<8xf32> to vector<8x1xf32>
    %144 = vector.broadcast %143 : vector<8x1xf32> to vector<8x8xf32>
    %145 = arith.subf %141, %144 : vector<8x8xf32>
    %146 = math.exp %145 : vector<8x8xf32>
    %cst_47 = arith.constant dense<0.000000e+00> : vector<8xf32>
    %147 = vector.multi_reduction <add>, %146, %cst_47 [1] : vector<8x8xf32> to vector<8xf32>
    %148 = vector.shape_cast %147 : vector<8xf32> to vector<8x1xf32>
    %149 = tpu.reciprocal %148 {approx = true} : vector<8x1xf32> -> vector<8x1xf32>
    %150 = vector.broadcast %149 : vector<8x1xf32> to vector<8x8xf32>
    %151 = arith.mulf %146, %150 : vector<8x8xf32>
    %152 = vector.extract_strided_slice %95 {offsets = [0, 16], sizes = [8, 8], strides = [1, 1]} : vector<8x32xf32> to vector<8x8xf32>
    %cst_48 = arith.constant dense<0.000000e+00> : vector<8x8xf32>
    %153 = tpu.matmul %151, %152, %cst_48 {dimension_numbers = #tpu.dot_dimension_numbers<[1], [0], [0], [1], [0, 0, 1, 1], [], []>} : vector<8x8xf32>, vector<8x8xf32>, vector<8x8xf32> -> vector<8x8xf32>
    %154 = vector.extract_strided_slice %8 {offsets = [16, 0], sizes = [8, 32], strides = [1, 1]} : vector<32x32xf32> to vector<8x32xf32>
    %cst_49 = arith.constant dense<0.000000e+00> : vector<8x32xf32>
    %155 = tpu.matmul %153, %154, %cst_49 {dimension_numbers = #tpu.dot_dimension_numbers<[1], [0], [0], [1], [0, 0, 1, 1], [], []>} : vector<8x8xf32>, vector<8x32xf32>, vector<8x32xf32> -> vector<8x32xf32>
    %156 = arith.addf %136, %155 : vector<8x32xf32>
    %157 = vector.extract_strided_slice %93 {offsets = [0, 24], sizes = [8, 8], strides = [1, 1]} : vector<8x32xf32> to vector<8x8xf32>
    %158 = vector.extract_strided_slice %94 {offsets = [0, 24], sizes = [8, 8], strides = [1, 1]} : vector<8x32xf32> to vector<8x8xf32>
    %cst_50 = arith.constant dense<0.000000e+00> : vector<8x8xf32>
    %159 = tpu.matmul %157, %158, %cst_50 {dimension_numbers = #tpu.dot_dimension_numbers<[1], [1], [0], [0], [0, 0, 1, 0], [], []>} : vector<8x8xf32>, vector<8x8xf32>, vector<8x8xf32> -> vector<8x8xf32>
    %cst_51 = arith.constant 0.176776692 : f32
    %160 = vector.broadcast %cst_51 : f32 to vector<8x8xf32>
    %161 = arith.mulf %159, %160 : vector<8x8xf32>
    %cst_52 = arith.constant dense<0xFF800000> : vector<8xf32>
    %162 = vector.multi_reduction <maximumf>, %161, %cst_52 [1] : vector<8x8xf32> to vector<8xf32>
    %163 = vector.shape_cast %162 : vector<8xf32> to vector<8x1xf32>
    %164 = vector.broadcast %163 : vector<8x1xf32> to vector<8x8xf32>
    %165 = arith.subf %161, %164 : vector<8x8xf32>
    %166 = math.exp %165 : vector<8x8xf32>
    %cst_53 = arith.constant dense<0.000000e+00> : vector<8xf32>
    %167 = vector.multi_reduction <add>, %166, %cst_53 [1] : vector<8x8xf32> to vector<8xf32>
    %168 = vector.shape_cast %167 : vector<8xf32> to vector<8x1xf32>
    %169 = tpu.reciprocal %168 {approx = true} : vector<8x1xf32> -> vector<8x1xf32>
    %170 = vector.broadcast %169 : vector<8x1xf32> to vector<8x8xf32>
    %171 = arith.mulf %166, %170 : vector<8x8xf32>
    %172 = vector.extract_strided_slice %95 {offsets = [0, 24], sizes = [8, 8], strides = [1, 1]} : vector<8x32xf32> to vector<8x8xf32>
    %cst_54 = arith.constant dense<0.000000e+00> : vector<8x8xf32>
    %173 = tpu.matmul %171, %172, %cst_54 {dimension_numbers = #tpu.dot_dimension_numbers<[1], [0], [0], [1], [0, 0, 1, 1], [], []>} : vector<8x8xf32>, vector<8x8xf32>, vector<8x8xf32> -> vector<8x8xf32>
    %174 = vector.extract_strided_slice %8 {offsets = [24, 0], sizes = [8, 32], strides = [1, 1]} : vector<32x32xf32> to vector<8x32xf32>
    %cst_55 = arith.constant dense<0.000000e+00> : vector<8x32xf32>
    %175 = tpu.matmul %173, %174, %cst_55 {dimension_numbers = #tpu.dot_dimension_numbers<[1], [0], [0], [1], [0, 0, 1, 1], [], []>} : vector<8x8xf32>, vector<8x32xf32>, vector<8x32xf32> -> vector<8x32xf32>
    %176 = arith.addf %156, %175 : vector<8x32xf32>
    %177 = tpu.concatenate %92, %176 in 0 : vector<8x32xf32>, vector<8x32xf32> -> vector<16x32xf32>
    %c0_56 = arith.constant 0 : index
    %c0_57 = arith.constant 0 : index
    %c0_58 = arith.constant 0 : index
    %178 = vector.load %arg6[%c0_56, %c0_57, %c0_58] : memref<1x1x32xf32, #tpu.memory_space<vmem>>, vector<1x1x32xf32>
    %179 = vector.shape_cast %178 : vector<1x1x32xf32> to vector<1x32xf32>
    %c0_59 = arith.constant 0 : index
    %c0_60 = arith.constant 0 : index
    %c0_61 = arith.constant 0 : index
    %180 = vector.load %arg7[%c0_59, %c0_60, %c0_61] : memref<1x1x32xf32, #tpu.memory_space<vmem>>, vector<1x1x32xf32>
    %181 = vector.shape_cast %180 : vector<1x1x32xf32> to vector<1x32xf32>
    %cst_62 = arith.constant dense<0.000000e+00> : vector<16xf32>
    %182 = vector.multi_reduction <add>, %177, %cst_62 [1] : vector<16x32xf32> to vector<16xf32>
    %183 = vector.shape_cast %182 : vector<16xf32> to vector<16x1xf32>
    %cst_63 = arith.constant 3.200000e+01 : f32
    %184 = vector.broadcast %cst_63 : f32 to vector<16x1xf32>
    %185 = arith.divf %183, %184 : vector<16x1xf32>
    %186 = vector.broadcast %185 : vector<16x1xf32> to vector<16x32xf32>
    %187 = arith.subf %177, %186 : vector<16x32xf32>
    %188 = arith.mulf %187, %187 : vector<16x32xf32>
    %cst_64 = arith.constant dense<0.000000e+00> : vector<16xf32>
    %189 = vector.multi_reduction <add>, %188, %cst_64 [1] : vector<16x32xf32> to vector<16xf32>
    %190 = vector.shape_cast %189 : vector<16xf32> to vector<16x1xf32>
    %cst_65 = arith.constant 0.0322580636 : f32
    %191 = vector.broadcast %cst_65 : f32 to vector<16x1xf32>
    %192 = arith.mulf %190, %191 : vector<16x1xf32>
    %193 = math.sqrt %192 : vector<16x1xf32>
    %cst_66 = arith.constant 9.99999997E-7 : f32
    %194 = vector.broadcast %cst_66 : f32 to vector<16x1xf32>
    %195 = arith.addf %193, %194 : vector<16x1xf32>
    %196 = tpu.reciprocal %195 : vector<16x1xf32> -> vector<16x1xf32>
    %197 = vector.broadcast %185 : vector<16x1xf32> to vector<16x32xf32>
    %198 = arith.subf %177, %197 : vector<16x32xf32>
    %199 = vector.broadcast %196 : vector<16x1xf32> to vector<16x32xf32>
    %200 = arith.mulf %198, %199 : vector<16x32xf32>
    %201 = vector.broadcast %179 : vector<1x32xf32> to vector<16x32xf32>
    %202 = arith.mulf %201, %200 : vector<16x32xf32>
    %203 = vector.broadcast %181 : vector<1x32xf32> to vector<16x32xf32>
    %204 = arith.addf %202, %203 : vector<16x32xf32>
    %c0_67 = arith.constant 0 : index
    %c0_68 = arith.constant 0 : index
    %c0_69 = arith.constant 0 : index
    %205 = vector.load %arg8[%c0_67, %c0_68, %c0_69] : memref<1x32x64xf32, #tpu.memory_space<vmem>>, vector<1x32x64xf32>
    %206 = vector.shape_cast %205 : vector<1x32x64xf32> to vector<32x64xf32>
    %cst_70 = arith.constant dense<0.000000e+00> : vector<16x64xf32>
    %207 = tpu.matmul %204, %206, %cst_70 {dimension_numbers = #tpu.dot_dimension_numbers<[1], [0], [0], [1], [0, 0, 1, 1], [], []>} : vector<16x32xf32>, vector<32x64xf32>, vector<16x64xf32> -> vector<16x64xf32>
    %c0_71 = arith.constant 0 : index
    %c0_72 = arith.constant 0 : index
    %c0_73 = arith.constant 0 : index
    %208 = vector.load %arg9[%c0_71, %c0_72, %c0_73] : memref<1x1x64xf32, #tpu.memory_space<vmem>>, vector<1x1x64xf32>
    %209 = vector.shape_cast %208 : vector<1x1x64xf32> to vector<1x64xf32>
    %210 = vector.broadcast %209 : vector<1x64xf32> to vector<16x64xf32>
    %211 = arith.addf %207, %210 : vector<16x64xf32>
    %cst_74 = arith.constant 0.000000e+00 : f32
    %212 = vector.broadcast %cst_74 : f32 to vector<16x64xf32>
    %213 = arith.maximumf %211, %212 : vector<16x64xf32>
    %c0_75 = arith.constant 0 : index
    %c0_76 = arith.constant 0 : index
    %c0_77 = arith.constant 0 : index
    %214 = vector.load %arg10[%c0_75, %c0_76, %c0_77] : memref<1x64x32xf32, #tpu.memory_space<vmem>>, vector<1x64x32xf32>
    %215 = vector.shape_cast %214 : vector<1x64x32xf32> to vector<64x32xf32>
    %cst_78 = arith.constant dense<0.000000e+00> : vector<16x32xf32>
    %216 = tpu.matmul %213, %215, %cst_78 {dimension_numbers = #tpu.dot_dimension_numbers<[1], [0], [0], [1], [0, 0, 1, 1], [], []>} : vector<16x64xf32>, vector<64x32xf32>, vector<16x32xf32> -> vector<16x32xf32>
    %c0_79 = arith.constant 0 : index
    %c0_80 = arith.constant 0 : index
    %c0_81 = arith.constant 0 : index
    %217 = vector.load %arg11[%c0_79, %c0_80, %c0_81] : memref<1x1x32xf32, #tpu.memory_space<vmem>>, vector<1x1x32xf32>
    %218 = vector.shape_cast %217 : vector<1x1x32xf32> to vector<1x32xf32>
    %219 = vector.broadcast %218 : vector<1x32xf32> to vector<16x32xf32>
    %220 = arith.addf %216, %219 : vector<16x32xf32>
    %221 = arith.addf %204, %220 : vector<16x32xf32>
    %c0_82 = arith.constant 0 : index
    %c0_83 = arith.constant 0 : index
    %c0_84 = arith.constant 0 : index
    %222 = vector.load %arg12[%c0_82, %c0_83, %c0_84] : memref<1x1x32xf32, #tpu.memory_space<vmem>>, vector<1x1x32xf32>
    %223 = vector.shape_cast %222 : vector<1x1x32xf32> to vector<1x32xf32>
    %c0_85 = arith.constant 0 : index
    %c0_86 = arith.constant 0 : index
    %c0_87 = arith.constant 0 : index
    %224 = vector.load %arg13[%c0_85, %c0_86, %c0_87] : memref<1x1x32xf32, #tpu.memory_space<vmem>>, vector<1x1x32xf32>
    %225 = vector.shape_cast %224 : vector<1x1x32xf32> to vector<1x32xf32>
    %cst_88 = arith.constant dense<0.000000e+00> : vector<16xf32>
    %226 = vector.multi_reduction <add>, %221, %cst_88 [1] : vector<16x32xf32> to vector<16xf32>
    %227 = vector.shape_cast %226 : vector<16xf32> to vector<16x1xf32>
    %cst_89 = arith.constant 3.200000e+01 : f32
    %228 = vector.broadcast %cst_89 : f32 to vector<16x1xf32>
    %229 = arith.divf %227, %228 : vector<16x1xf32>
    %230 = vector.broadcast %229 : vector<16x1xf32> to vector<16x32xf32>
    %231 = arith.subf %221, %230 : vector<16x32xf32>
    %232 = arith.mulf %231, %231 : vector<16x32xf32>
    %cst_90 = arith.constant dense<0.000000e+00> : vector<16xf32>
    %233 = vector.multi_reduction <add>, %232, %cst_90 [1] : vector<16x32xf32> to vector<16xf32>
    %234 = vector.shape_cast %233 : vector<16xf32> to vector<16x1xf32>
    %cst_91 = arith.constant 0.0322580636 : f32
    %235 = vector.broadcast %cst_91 : f32 to vector<16x1xf32>
    %236 = arith.mulf %234, %235 : vector<16x1xf32>
    %237 = math.sqrt %236 : vector<16x1xf32>
    %cst_92 = arith.constant 9.99999997E-7 : f32
    %238 = vector.broadcast %cst_92 : f32 to vector<16x1xf32>
    %239 = arith.addf %237, %238 : vector<16x1xf32>
    %240 = tpu.reciprocal %239 : vector<16x1xf32> -> vector<16x1xf32>
    %241 = vector.broadcast %229 : vector<16x1xf32> to vector<16x32xf32>
    %242 = arith.subf %221, %241 : vector<16x32xf32>
    %243 = vector.broadcast %240 : vector<16x1xf32> to vector<16x32xf32>
    %244 = arith.mulf %242, %243 : vector<16x32xf32>
    %245 = vector.broadcast %223 : vector<1x32xf32> to vector<16x32xf32>
    %246 = arith.mulf %245, %244 : vector<16x32xf32>
    %247 = vector.broadcast %225 : vector<1x32xf32> to vector<16x32xf32>
    %248 = arith.addf %246, %247 : vector<16x32xf32>
    %c0_93 = arith.constant 0 : index
    %c0_94 = arith.constant 0 : index
    %249 = vector.load %arg3[%c0_93, %c0_94] : memref<16x32xf32, #tpu.memory_space<vmem>>, vector<16x32xf32>
    %250 = arith.mulf %248, %249 : vector<16x32xf32>
    %c0_95 = arith.constant 0 : index
    %c0_96 = arith.constant 0 : index
    %251 = vector.load %arg15[%c0_95, %c0_96] : memref<16x32xf32, #tpu.memory_space<vmem>>, vector<16x32xf32>
    tpu.vector_store %arg15[%c0_95, %c0_96], %250 {strides = array<i32>} : memref<16x32xf32, #tpu.memory_space<vmem>>, vector<16x32xf32>,
    %c0_97 = arith.constant 0 : index
    %c0_98 = arith.constant 0 : index
    %c0_99 = arith.constant 0 : index
    %252 = vector.load %arg14[%c0_97, %c0_98, %c0_99] : memref<1x16x32xf32, #tpu.memory_space<vmem>>, vector<1x16x32xf32>
    %253 = vector.shape_cast %252 : vector<1x16x32xf32> to vector<16x32xf32>
    %254 = vector.shape_cast %250 : vector<16x32xf32> to vector<1x16x32xf32>
    tpu.vector_store %arg14[%c0_97, %c0_98, %c0_99], %254 {strides = array<i32>} : memref<1x16x32xf32, #tpu.memory_space<vmem>>, vector<1x16x32xf32>,
    return
  }
  func.func @transform_0(%arg0: i32) -> (i32, i32) {
    %c0_i32 = arith.constant 0 : i32
    %c0_i32_0 = arith.constant 0 : i32
    %c0_i32_1 = arith.constant 0 : i32
    return %c0_i32, %c0_i32_0 : i32, i32
  }
  func.func @transform_1(%arg0: i32) -> (i32, i32) {
    %c0_i32 = arith.constant 0 : i32
    %c0_i32_0 = arith.constant 0 : i32
    %c0_i32_1 = arith.constant 0 : i32
    return %c0_i32, %c0_i32_0 : i32, i32
  }
  func.func @transform_2(%arg0: i32) -> (i32, i32) {
    %c0_i32 = arith.constant 0 : i32
    %c0_i32_0 = arith.constant 0 : i32
    %c0_i32_1 = arith.constant 0 : i32
    return %c0_i32, %c0_i32_0 : i32, i32
  }
  func.func @transform_3(%arg0: i32) -> (i32, i32, i32) {
    %c0_i32 = arith.constant 0 : i32
    %c0_i32_0 = arith.constant 0 : i32
    %c0_i32_1 = arith.constant 0 : i32
    return %arg0, %c0_i32, %c0_i32_0 : i32, i32, i32
  }
  func.func @transform_4(%arg0: i32) -> (i32, i32, i32) {
    %c0_i32 = arith.constant 0 : i32
    %c0_i32_0 = arith.constant 0 : i32
    %c0_i32_1 = arith.constant 0 : i32
    return %arg0, %c0_i32, %c0_i32_0 : i32, i32, i32
  }
  func.func @transform_5(%arg0: i32) -> (i32, i32, i32) {
    %c0_i32 = arith.constant 0 : i32
    %c0_i32_0 = arith.constant 0 : i32
    %c0_i32_1 = arith.constant 0 : i32
    return %arg0, %c0_i32, %c0_i32_0 : i32, i32, i32
  }
  func.func @transform_6(%arg0: i32) -> (i32, i32, i32) {
    %c0_i32 = arith.constant 0 : i32
    %c0_i32_0 = arith.constant 0 : i32
    %c0_i32_1 = arith.constant 0 : i32
    return %arg0, %c0_i32, %c0_i32_0 : i32, i32, i32
  }
  func.func @transform_7(%arg0: i32) -> (i32, i32, i32) {
    %c0_i32 = arith.constant 0 : i32
    %c0_i32_0 = arith.constant 0 : i32
    %c0_i32_1 = arith.constant 0 : i32
    return %arg0, %c0_i32, %c0_i32_0 : i32, i32, i32
  }
  func.func @transform_8(%arg0: i32) -> (i32, i32, i32) {
    %c0_i32 = arith.constant 0 : i32
    %c0_i32_0 = arith.constant 0 : i32
    %c0_i32_1 = arith.constant 0 : i32
    return %arg0, %c0_i32, %c0_i32_0 : i32, i32, i32
  }
  func.func @transform_9(%arg0: i32) -> (i32, i32, i32) {
    %c0_i32 = arith.constant 0 : i32
    %c0_i32_0 = arith.constant 0 : i32
    %c0_i32_1 = arith.constant 0 : i32
    return %arg0, %c0_i32, %c0_i32_0 : i32, i32, i32
  }
  func.func @transform_10(%arg0: i32) -> (i32, i32, i32) {
    %c0_i32 = arith.constant 0 : i32
    %c0_i32_0 = arith.constant 0 : i32
    %c0_i32_1 = arith.constant 0 : i32
    return %arg0, %c0_i32, %c0_i32_0 : i32, i32, i32
  }
  func.func @transform_11(%arg0: i32) -> (i32, i32, i32) {
    %c0_i32 = arith.constant 0 : i32
    %c0_i32_0 = arith.constant 0 : i32
    %c0_i32_1 = arith.constant 0 : i32
    return %arg0, %c0_i32, %c0_i32_0 : i32, i32, i32
  }
  func.func @transform_12(%arg0: i32) -> (i32, i32, i32) {
    %c0_i32 = arith.constant 0 : i32
    %c0_i32_0 = arith.constant 0 : i32
    %c0_i32_1 = arith.constant 0 : i32
    return %arg0, %c0_i32, %c0_i32_0 : i32, i32, i32
  }
  func.func @transform_13(%arg0: i32) -> (i32, i32, i32) {
    %c0_i32 = arith.constant 0 : i32
    %c0_i32_0 = arith.constant 0 : i32
    %c0_i32_1 = arith.constant 0 : i32
    return %arg0, %c0_i32, %c0_i32_0 : i32, i32, i32
  }
}

</mosaic_0001>

<bundles_post_ra>
// kernel: tpu_custom_call.1
= control target key start
LH: loop header
LB: loop body
LE: loop exit
PB: predicated region body
PF: predicated region fallthrough
CT: control target
= control target key end

     0   :  { %s4441_s0 = inlined_call_operand.hbm [shape: f32[16,32], index: 0, kind: input, shape index: {}]   ;;  %s4442_s1 = inlined_call_operand.hbm [shape: f32[16,32], index: 1, kind: input, shape index: {}]   ;;  %s4443_s2 = inlined_call_operand.hbm [shape: f32[16,32], index: 2, kind: input, shape index: {}]   ;;  %s4444_s3 = inlined_call_operand.vmem [shape: f32[2,32,96], index: 3, kind: input, shape index: {}]   ;;  %s4445_s4 = inlined_call_operand.vmem [shape: f32[2,32,32], index: 4, kind: input, shape index: {}]   ;;  %s4446_s5 = inlined_call_operand.vmem [shape: f32[2,1,32], index: 5, kind: input, shape index: {}]   ;;  %s4447_s6 = inlined_call_operand.vmem [shape: f32[2,1,32], index: 6, kind: input, shape index: {}]   ;;  %s4448_s7 = inlined_call_operand.vmem [shape: f32[2,32,64], index: 7, kind: input, shape index: {}]   ;;  %s4449_s8 = inlined_call_operand.vmem [shape: f32[2,1,64], index: 8, kind: input, shape index: {}]   ;;  %s4450_s9 = inlined_call_operand.vmem [shape: f32[2,64,32], index: 9, kind: input, shape index: {}]   ;;  %s4451_s10 = inlined_call_operand.vmem [shape: f32[2,1,32], index: 10, kind: input, shape index: {}]   ;;  %s4452_s11 = inlined_call_operand.vmem [shape: f32[2,1,32], index: 11, kind: input, shape index: {}]   ;;  %s4453_s12 = inlined_call_operand.vmem [shape: f32[2,1,32], index: 12, kind: input, shape index: {}]   ;;  %s4454_s13 = inlined_call_operand.hbm [shape: f32[2,16,32], index: 13, kind: output, shape index: {}]  }
   0x1   :  { %4468 = sst [smem:[#allocation20_spill]] %s4441_s0 }
   0x2   :  { %4469 = sst [smem:[#allocation21_spill]] %s4442_s1 }
   0x3   :  { %4470 = sst [smem:[#allocation22_spill]] %s4443_s2 }
   0x4   :  { %4471 = sst [smem:[#allocation23_spill]] %s4444_s3 }
   0x5   :  { %4472 = sst [smem:[#allocation24_spill]] %s4445_s4 }
   0x6   :  { %4473 = sst [smem:[#allocation25_spill]] %s4453_s12 }
   0x7   :  { %4474 = sst [smem:[#allocation26_spill]] %s4454_s13 }
   0x8   :  { %18 = vsyncpa [#allocation4], 0 }
   0x9   :  { %19 = vsyncpa [#allocation7], 0 }
   0xa   :  { %20 = vsyncpa [#allocation5], 0 }
   0xb   :  { %22 = vsyncpa [#allocation5 + $0x1], 0  ;;  %s3903_s25 = smov 0   ;;  %s3905_s26 = smov 0  }
   0xc   :  { %s3907_s27 = smov 0   ;;  %s3909_s28 = smov 0  }
   0xd LB: > { %4475 = sst [smem:[#allocation13_spill]] %s3798_s25  ;;  %s3924_s29 = sadd.s32 4294967295, %s3810_s28   ;;  %s3810_s28 = sphi %s3909_s28, %s4511_s28   ;;  %s3806_s27 = sphi %s3907_s27, %s4513_s27   ;;  %s3802_s26 = sphi %s3905_s26, %s4515_s26   ;;  %s3798_s25 = sphi %s3903_s25, %s4514_s25  }
   0xe   : > { %4476 = sst [smem:[#allocation14_spill]] %s3806_s27  ;;  %s3170_s30 = sadd.s32 4294967294, %s3810_s28  }
   0xf   : > { %4477 = sst [smem:[#allocation15_spill]] %s3810_s28  ;;  %s3928_s14 = sadd.s32 1, %s3810_s28  }
  0x10   : > { %4478 = sst [smem:[#allocation16_spill]] %s3928_s14  ;;  %s358_s15 = sadd.s32 1, %s3806_s27 }
  0x11   : > { %s355_s16 = ssub.s32 %s3810_s28, %s3928_s14  ;;  %p368_p0 = scmp.ne.s32.totalorder %s3806_s27, %s3802_s26 }
  0x12   : > { %p356_p1 = scmp.eq.s32.totalorder %s355_s16, 0  ;;  %p369_p2 = scmp.eq.s32.totalorder %s3924_s29, 1 }
  0x13   : > { %p374_p3 = scmp.ne.s32.totalorder %s3802_s26, %s3798_s25  ;;  %p375_p4 = scmp.eq.s32.totalorder %s3170_s30, 1 }
  0x14   : > { %s3939_s17 = scalar_select %p356_p1, %s3806_s27, %s358_s15  }
  0x15   : > { %p3941_p5 = por %p369_p2, %p368_p0  ;;  %p3945_p6 = por %p375_p4, %p374_p3 }
  0x16   : > { %4479 = sst [smem:[#allocation17_spill]] %s3939_s17  ;;  %p3171_p7 = scmp.ge.s32.totalorder %s3810_s28, 1 }
  0x17   : > { %s4480_s18 = scalar_select %p3941_p5, 1, 0 }
  0x18   : > { %s4482_s19 = scalar_select %p3945_p6, 1, 0 }
  0x19   : > { %4481 = sst [smem:[#allocation18_spill]] %s4480_s18  ;;  %p382_p8 = scmp.lt.s32.totalorder %s3810_s28, 3 }
  0x1a   : > { %4483 = sst [smem:[#allocation19_spill]] %s4482_s19  ;;  %p4460_p10 = scmp.eq.s32.totalorder %s3924_s29, 0 }
  0x1b   : > { %p3953_p11 = pnand %p3171_p7, %p382_p8  ;;  %s3812_s21 = smov [#allocation6]  }
  0x1c   : > { %s407_s22 = sshll.u32 %s3812_s21, 4  ;;  %s3813_s24 = smov [#allocation3]   ;;  %s3959_s22 = int_to_ptr.vmem [resolvable:$true] %s407_s22 }
  0x1d   : > { %s4484_s20 = scalar_select %p3953_p11, 1, 0 }
  0x1e   : > { %p3535_p12 = pneg %p3953_p11  ;;  %s394_s30 = sshll.u32 %s3813_s24, 4  ;;  %s3967_s30 = int_to_ptr.vmem [resolvable:$true] %s394_s30 }
  0x1f   : > { %s3814_s15 = smov [#allocation8]   ;;  %s4486_s1 = sld [smem:[#allocation21_spill]] }
  0x20   : > { %p3963_p13 = pnand %p4460_p10, %p3535_p12  ;;  %s3969_s16 = sshll.u32 %s3814_s15, 4  ;;  %s421_s16 = int_to_ptr.vmem [resolvable:$true] %s3969_s16 }
  0x22   : > { %p3979_p1 = pneg %p3963_p13 }
  0x25   : > { %s3656_s14 = scalar_lea.hbm %s4486_s1, 256 }
  0x26   : > { %p3657_p0 = scmp.ne.s32.totalorder %s4486_s1, %s3656_s14  ;;  %p3663_p4 = scmp.lt.u32.totalorder %s3656_s14, %s4486_s1 }
  0x28   : > { %p3659_p2 = pnand %p3979_p1, %p3657_p0 }
  0x2a   : > { %p3660_p3 = pneg %p3659_p2 }
  0x2c   : > { %p3665_p7 = pnand %p3663_p4, %p3660_p3 }
  0x2e   : > { %3668 = shalt.err (!%p3665_p7)
}
  0x2f   : > { %s3669_s27 = scalar_lea.vmem %s3959_s22, 256  ;;  %p3677_p10 = scmp.lt.s32.totalorder %s3959_s22, %s3959_s22 }
  0x30   : > { %p3670_p8 = scmp.ne.s32.totalorder %s3959_s22, %s3669_s27  ;;  %p3678_p6 = scmp.lt.s32.totalorder %s3669_s27, %s3669_s27 }
  0x32   : > { %p3672_p12 = pnand %p3670_p8, %p3979_p1  ;;  %p3679_p0 = por %p3678_p6, %p3677_p10 }
  0x34   : > { %p3673_p9 = pneg %p3672_p12 }
  0x36   : > { %p3680_p2 = pnand %p3679_p0, %p3673_p9 }
  0x38   : > { %3683 = shalt.err (!%p3680_p2)
}
  0x39   : > { %s3815_s17 = smov 128   ;;  %s3816_s14 = smov 8  }
  0x3a   : > { %3541 = dma.hbm_to_vmem [thread:$0]  (!%p3963_p13), %s4486_s1, 256, %s3959_s22, [#allocation7], %s3815_s17, %s3815_s17, %s3816_s14  }
  0x3b   : > { %s4488_s0 = sld [smem:[#allocation20_spill]] }
  0x41   : > { %s3684_s27 = scalar_lea.hbm %s4488_s0, 256 }
  0x42   : > { %p3685_p6 = scmp.ne.s32.totalorder %s4488_s0, %s3684_s27  ;;  %p3691_p3 = scmp.lt.u32.totalorder %s3684_s27, %s4488_s0 }
  0x44   : > { %p3687_p9 = pnand %p3685_p6, %p3979_p1 }
  0x46   : > { %p3688_p10 = pneg %p3687_p9 }
  0x48   : > { %p3693_p4 = pnand %p3691_p3, %p3688_p10 }
  0x4a   : > { %3696 = shalt.err (!%p3693_p4)
}
  0x4b   : > { %s3697_s22 = scalar_lea.vmem %s3967_s30, 256  ;;  %p3705_p0 = scmp.lt.s32.totalorder %s3967_s30, %s3967_s30 }
  0x4c   : > { %p3698_p7 = scmp.ne.s32.totalorder %s3967_s30, %s3697_s22  ;;  %p3706_p2 = scmp.lt.s32.totalorder %s3697_s22, %s3697_s22 }
  0x4e   : > { %p3700_p8 = pnand %p3698_p7, %p3979_p1  ;;  %p3707_p6 = por %p3706_p2, %p3705_p0 }
  0x50   : > { %p3701_p12 = pneg %p3700_p8 }
  0x52   : > { %p3708_p9 = pnand %p3707_p6, %p3701_p12 }
  0x54   : > { %3711 = shalt.err (!%p3708_p9)
}
  0x55   : > { %3538 = dma.hbm_to_vmem [thread:$0]  (!%p3963_p13), %s4488_s0, 256, %s3967_s30, [#allocation4], %s3815_s17, %s3815_s17, %s3816_s14  }
  0x56   : > { %s4489_s2 = sld [smem:[#allocation22_spill]] }
  0x5c   : > { %s3712_s19 = scalar_lea.hbm %s4489_s2, 256 }
  0x5d   : > { %p3713_p10 = scmp.ne.s32.totalorder %s4489_s2, %s3712_s19  ;;  %p3719_p7 = scmp.lt.u32.totalorder %s3712_s19, %s4489_s2 }
  0x5f   : > { %p3715_p3 = pnand %p3713_p10, %p3979_p1 }
  0x61   : > { %p3716_p4 = pneg %p3715_p3 }
  0x63   : > { %p3721_p8 = pnand %p3719_p7, %p3716_p4 }
  0x65   : > { %3724 = shalt.err (!%p3721_p8)
}
  0x66   : > { %s3725_s22 = scalar_lea.vmem %s421_s16, 256  ;;  %p3733_p6 = scmp.lt.s32.totalorder %s421_s16, %s421_s16 }
  0x67   : > { %p3726_p12 = scmp.ne.s32.totalorder %s421_s16, %s3725_s22  ;;  %p3734_p9 = scmp.lt.s32.totalorder %s3725_s22, %s3725_s22 }
  0x69   : > { %p3728_p0 = pnand %p3726_p12, %p3979_p1  ;;  %p3735_p5 = por %p3734_p9, %p3733_p6 }
  0x6b   : > { %p3729_p2 = pneg %p3728_p0 }
  0x6d   : > { %p3736_p11 = pnand %p3735_p5, %p3729_p2 }
  0x6f   : > { %3739 = shalt.err (!%p3736_p11)
}
  0x70   : > { %3544 = dma.hbm_to_vmem [thread:$0]  (!%p3963_p13), %s4489_s2, 256, %s421_s16, [#allocation7], %s3815_s17, %s3815_s17, %s3816_s14  }
  0x71   : > { %p4490_p10 = scmp.ne.s32.totalorder %s4484_s20, 0 }
  0x72   : > { %p4491_p1 = scmp.eq.s32.totalorder (!%p4490_p10), %s3924_s29, 0 }
  0x73   : > { %504 = sbr.rel (%p4490_p10) target bundleno = 4691 (0x1253), region = 72 }
  0x7a   : > { %3785 = dma.done.wait (%p4491_p1), [#allocation4], 256   ;;  %p4492_p3 = pmov %p4491_p1 }
  0x7b   : > { %p4493_p5 = pmov %p4491_p1 }
  0x7c   : > { %3787 = vsyncadd (%p4492_p3), [#allocation4], 4294967040 }
  0x7d   : > { %3789 = dma.done.wait (%p4493_p5), [#allocation7], 512   ;;  %p4494_p11 = pmov %p4491_p1 }
  0x7e   : > { %s4467_s25 = sand.u32 1, %s3802_s26   ;;  %p589_p13 = scmp.lt.s32.totalorder %s3924_s29, 1 }
  0x7f   : > { %3791 = vsyncadd (%p4494_p11), [#allocation7], 4294966784  ;;  %s3180_s20 = sshll.u32 %s4467_s25, 4  ;;  %s4495_s3 = sld [smem:[#allocation23_spill]] }
  0x80   : > { %s4066_s23 = scalar_select %p589_p13, %s3924_s29, 1 }
  0x81   : > { %s4496_s4 = sld [smem:[#allocation24_spill]]  ;;  %s4114_s17 = scalar_lea.vmem [#allocation9], %s3180_s20 }
  0x82   : > { %s3239_s16 = sshll.u32 %s4066_s23, 5  ;;  %s612_s28 = scalar_lea.vmem %s4449_s8, %s4066_s23 }
  0x83   : > { %s4090_s0 = scalar_lea.vmem %s4448_s7, %s3239_s16  ;;  %s3242_s18 = sshll.u32 %s4066_s23, 6 }
  0x84   : > { %s4100_s21 = scalar_lea.vmem %s4450_s9, %s3242_s18  ;;  %s620_s27 = scalar_lea.vmem %s4451_s10, %s4066_s23 }
  0x85   : > { %s4076_s19 = scalar_lea.vmem %s4495_s3, %s3239_s16  ;;  %s623_s25 = scalar_lea.vmem %s4452_s11, %s4066_s23 }
  0x86   : > { %s4497_s3 = sld [smem:[#allocation25_spill]]  ;;  %p4498_p4 = scmp.ne.s32.totalorder %s3924_s29, 0 }
  0x87   : > { %s4081_s15 = scalar_lea.vmem %s4496_s4, %s3239_s16  ;;  %v631_v0 = vld [vmem:[#allocation3] sm:$0xff] (!%p4498_p4)  ;;  %v633_v1 = vld [vmem:[#allocation6] sm:$0xff] (!%p4498_p4)  ;;  %v632_v4 = vld [vmem:[#allocation3 + $0x8] sm:$0xff] (!%p4498_p4)  ;;  %vm641_vm0 = vcmask (!%p4498_p4), 261120  }
  0x88   : > { %630 = sbr.rel (%p4498_p4) target bundleno = 143 (0x8f), region = 88  ;;  %v637_v2 = vld [vmem:[#allocation8] sm:$0xff] (!%p4498_p4)  ;;  %v635_v3 = vadd.f32 (!%p4498_p4), %v633_v1, %v631_v0  ;;  %v634_v5 = vld [vmem:[#allocation6 + $0x8] sm:$0xff] (!%p4498_p4)  ;;  %v638_v6 = vld [vmem:[#allocation8 + $0x8] sm:$0xff] (!%p4498_p4) }
  0x89   : > { %v636_v7 = vadd.f32 (!%p4498_p4), %v634_v5, %v632_v4 }
  0x8a   : > { %v639_v8 = vmul.f32 (!%p4498_p4), %v637_v2, %v635_v3 }
  0x8b   : > { %v640_v9 = vmul.f32 (!%p4498_p4), %v638_v6, %v636_v7 }
  0x8c   : > { %s626_s4 = scalar_lea.vmem %s4497_s3, %s4066_s23  ;;  %642 = vst.msk [vmem:[#allocation2] sm:$0xff] (!%p4498_p4), %vm641_vm0, %v639_v8 }
  0x8d   : > { %643 = vst.msk [vmem:[#allocation2 + $0x8] sm:$0xff] (!%p4498_p4), %vm641_vm0, %v640_v9 }
  0x8f PF: > { %v646_v10 = vld [vmem:[%s4076_s19] sm:$0xff]  ;;  %v647_v11 = vld [vmem:[%s4076_s19 + $0x8] sm:$0xff]  ;;  %v648_v12 = vld [vmem:[%s4076_s19 + $0x10] sm:$0xff]  ;;  %vm650_vm1 = vcmask 261120   ;;  %v3817_v18 = vmov 0.0   ;;  %vm3818_vm2 = vmmov 0   ;;  %s4499_s12 = scalar_lea.vmem %s4446_s5, %s4066_s23 }
  0x90   : > { %v3475_v13 = vpack.c.bf16 %v647_v11, %v646_v10  ;;  %v649_v14 = vld [vmem:[%s4076_s19 + $0x18] sm:$0xff]  ;;  %3335 = vmatprep.subr.mxu0 %v3817_v18  ;;  %3337 = vmatprep.mubr.msk.f32.mxu0 %vm3818_vm2, %v3817_v18  ;;  %s3819_s1 = smov 64   ;;  %s3820_s2 = smov 96   ;;  %vm739_vm3 = vcmask 64512   ;;  %v4175_v39 = vld [vmem:[%s4081_s15] sm:$0xff]  ;;  %vm2823_vm8 = vcmask 523264  }
  0x91   : > { %v3479_v16 = vpack.c.bf16 %v649_v14, %v648_v12  ;;  %s3821_s3 = smov 88   ;;  %s3822_s20 = smov 120   ;;  %3336 = vmatpush3.msra.mxu0 %v4175_v39 }
  0x92   : > { %3476 = vmatprep.subr.bf16.mxu1 %v3475_v13  ;;  %s3823_s13 = smov 80   ;;  %s3824_s19 = smov 112   ;;  %3345 = vmatprep.subr.mxu0 %v3817_v18 }
  0x93   : > { %v4122_v15 = vld [vmem:[#allocation2] sm:$0xff]  ;;  %3478 = vmatpush3.bf16.msra.mxu1 %v3475_v13  ;;  %s3825_s30 = smov 48   ;;  %s3826_s14 = smov 72  }
  0x94   : > { %3322 = vmatprep.mubr.msk.f32.mxu1 %vm650_vm1, %v4122_v15  ;;  %3480 = vmatprep.subr.bf16.mxu1 %v3479_v16  ;;  %v4126_v17 = vld [vmem:[#allocation2 + $0x8] sm:$0xff]  ;;  %s3827_s18 = smov 104   ;;  %s3828_s24 = smov 56  }
  0x95   : > { %s3829_s22 = smov 40  }
  0x97   : > { %3482 = vmatpush3.bf16.msra.mxu1 %v3479_v16 }
  0x98   : > { %3325 = vmatprep.subr.mxu1 %v3817_v18 }
  0x9a   : > { %3323 = vmatmul.mubr.msk.f32.vlgmr.msra.gmra.mrb[0].mxu1 %vm650_vm1, %v4126_v17 }
  0x9b   : > { %3327 = vmatprep.mubr.msk.f32.mxu1 %vm3818_vm2, %v3817_v18 }
 0x16d   : > { %v4136_v19 = vpop.f32.mrb[0].mxu1 }
 0x16e   : > { %v4138_v20 = vpop.f32.mrb[1].mxu1 }
 0x16f   : > { %826 = vrot.lane.b32.xlu1 %v4138_v20, %s3819_s1  ;;  %737 = vrot.lane.b32.xlu0 %v4138_v20, %s3820_s2 }
 0x173   : > { %978 = vrot.lane.b32.xlu1 %v4138_v20, %s3821_s3 }
 0x177   : > { %976 = vrot.lane.b32.xlu1 %v4138_v20, %s3822_s20 }
 0x17b   : > { %1218 = vrot.lane.b32.xlu1 %v4138_v20, %s3823_s13 }
 0x1e1   : > { %v738_v21 = vpop.permute.xlu0 %737  ;;  %v827_v22 = vpop.permute.xlu1 %826 }
 0x1e2   : > { %3326 = vmatpush3.xpose.msk.msra.mxu1 %vm739_vm3, %v738_v21 }
 0x1e3   : > { %3330 = vmatprep.subr.mxu1 %v3817_v18 }
 0x1e5   : > { %3328 = vmatmul.mubr.msk.f32.vlgmr.msra.gmra.mrb[2].mxu1 %vm739_vm3, %v4138_v20  ;;  %v979_v32 = vpop.permute.xlu1 %978 }
 0x1e6   : > { %3331 = vmatpush3.msra.mxu1 %v827_v22  ;;  %3332 = vmatprep.mubr.msk.f32.mxu1 %vm3818_vm2, %v3817_v18 }
 0x1e7   : > { %3340 = vmatprep.subr.mxu1 %v3817_v18 }
 0x1e9   : > { %v977_v33 = vpop.permute.xlu1 %976 }
 0x1ed   : > { %v1219_v34 = vpop.permute.xlu1 %1218 }
 0x2b8   : > { %v810_v23 = vpop.f32.mrb[2].mxu1 }
 0x2b9   : > { %v814_v24 = vmul.f32 0.17677669, %v810_v23  ;;  %v3329_v25 = vpop.f32.mrb[3].mxu1 }
 0x2bb   : > { %v815_v26 = vsel %vm739_vm3, %v814_v24, -inf }
 0x2bc   : > { %816 = vmax.xlane.f32.xlu0 %v815_v26 }
 0x349   : > { %v817_v27 = vpop.xlane.xlu0 %816 }
 0x34a   : > { %v818_v28 = vsub.f32 %v814_v24, %v817_v27 }
 0x34c   : > { %v819_v29 = vmul.f32 1.442695, %v818_v28 }
 0x34e   : > { %3608 = vpow2.f32 %v819_v29 }
 0x358   : > { %v3609_v30 = vpop.eup %3608 }
 0x359   : > { %v821_v31 = vsel %vm739_vm3, %v3609_v30, 0.0 }
 0x35a   : > { %822 = vadd.xlane.f32.xlu1 %v821_v31 }
 0x36b   : > { %1216 = vrot.lane.b32.xlu1 %v4138_v20, %s3824_s19 }
 0x3e7   : > { %v823_v35 = vpop.xlane.xlu1 %822 }
 0x3e8   : > { %3610 = vrcp.f32 %v823_v35 }
 0x3eb   : > { %v1217_v38 = vpop.permute.xlu1 %1216 }
 0x3f2   : > { %v3611_v36 = vpop.eup %3610 }
 0x3f3   : > { %v825_v37 = vmul.f32 %v3611_v36, %v3609_v30 }
 0x3f5   : > { %3333 = vmatmul.mubr.msk.f32.vlgmr.msra.gmra.mrb[4].mxu1 %vm739_vm3, %v825_v37 }
 0x3f6   : > { %3341 = vmatpush3.xpose.msk.msra.mxu1 %vm739_vm3, %v979_v32  ;;  %3342 = vmatprep.mubr.msk.f32.mxu1 %vm3818_vm2, %v3817_v18 }
 0x3f7   : > { %3355 = vmatprep.subr.mxu1 %v3817_v18 }
 0x3f9   : > { %3343 = vmatmul.mubr.msk.f32.vlgmr.msra.gmra.mrb[6].mxu1 %vm739_vm3, %v977_v33 }
 0x3fa   : > { %3356 = vmatpush3.xpose.msk.msra.mxu1 %vm739_vm3, %v1219_v34  ;;  %3357 = vmatprep.mubr.msk.f32.mxu1 %vm3818_vm2, %v3817_v18 }
 0x3fb   : > { %3360 = vmatprep.subr.mxu1 %v3817_v18 }
 0x3fd   : > { %3358 = vmatmul.mubr.msk.f32.vlgmr.msra.gmra.mrb[8].mxu1 %vm739_vm3, %v1217_v38 }
 0x3fe   : > { %3362 = vmatprep.mubr.msk.f32.mxu1 %vm3818_vm2, %v3817_v18 }
 0x4c8   : > { %v898_v40 = vpop.f32.mrb[4].mxu1 }
 0x4c9   : > { %v3334_v41 = vpop.f32.mrb[5].mxu1  ;;  %3338 = vmatmul.mubr.msk.f32.vlgmr.msra.gmra.mrb[0].mxu0 %vm739_vm3, %v898_v40 }
 0x4ca   : > { %3347 = vmatprep.mubr.msk.f32.mxu0 %vm3818_vm2, %v3817_v18 }
 0x4cc   : > { %v4182_v42 = vpop.f32.mrb[6].mxu1 }
 0x4cd   : > { %v3344_v43 = vpop.f32.mrb[7].mxu1  ;;  %v1054_v10 = vmul.f32 0.17677669, %v4182_v42 }
 0x4cf   : > { %v1055_v11 = vsel %vm739_vm3, %v1054_v10, -inf }
 0x4d0   : > { %v1290_v44 = vpop.f32.mrb[8].mxu1 }
 0x4d1   : > { %v1294_v45 = vmul.f32 0.17677669, %v1290_v44  ;;  %v3359_v46 = vpop.f32.mrb[9].mxu1 }
 0x4d3   : > { %v1295_v47 = vsel %vm739_vm3, %v1294_v45, -inf }
 0x4d4   : > { %1296 = vmax.xlane.f32.xlu0 %v1295_v47 }
 0x4ea   : > { %1306 = vrot.lane.b32.xlu0 %v4138_v20, %s3825_s30 }
 0x4ee   : > { %1458 = vrot.lane.b32.xlu0 %v4138_v20, %s3826_s14 }
 0x4f2   : > { %1456 = vrot.lane.b32.xlu0 %v4138_v20, %s3827_s18 }
 0x4f6   : > { %1697 = vrot.lane.b32.xlu0 %v4136_v19, %s3820_s2  ;;  %s3830_s2 = smov [#allocation9]  }
 0x561   : > { %v1297_v48 = vpop.xlane.xlu0 %1296 }
 0x562   : > { %v1298_v49 = vsub.f32 %v1294_v45, %v1297_v48 }
 0x564   : > { %v1299_v50 = vmul.f32 1.442695, %v1298_v49 }
 0x565   : > { %v1307_v51 = vpop.permute.xlu0 %1306 }
 0x566   : > { %3612 = vpow2.f32 %v1299_v50  ;;  %3361 = vmatpush3.msra.mxu1 %v1307_v51 }
 0x567   : > { %3370 = vmatprep.subr.mxu1 %v3817_v18 }
 0x569   : > { %v1459_v55 = vpop.permute.xlu0 %1458 }
 0x56d   : > { %v1457_v57 = vpop.permute.xlu0 %1456 }
 0x570   : > { %v3613_v52 = vpop.eup %3612 }
 0x571   : > { %v1301_v53 = vsel %vm739_vm3, %v3613_v52, 0.0  ;;  %v1698_v59 = vpop.permute.xlu0 %1697 }
 0x572   : > { %1302 = vadd.xlane.f32.xlu1 %v1301_v53 }
 0x583   : > { %1785 = vrot.lane.b32.xlu1 %v4136_v19, %s3819_s1 }
 0x587   : > { %1937 = vrot.lane.b32.xlu1 %v4136_v19, %s3821_s3  ;;  %s4500_s3 = scalar_lea.vmem %s4447_s6, %s4066_s23 }
 0x5ff   : > { %v1303_v54 = vpop.xlane.xlu1 %1302 }
 0x600   : > { %3614 = vrcp.f32 %v1303_v54 }
 0x603   : > { %v1786_v60 = vpop.permute.xlu1 %1785 }
 0x607   : > { %v1938_v14 = vpop.permute.xlu1 %1937 }
 0x60a   : > { %v3615_v56 = vpop.eup %3614 }
 0x60b   : > { %v1305_v58 = vmul.f32 %v3615_v56, %v3613_v52  ;;  %v4262_v52 = vld [vmem:[%s4081_s15 + $0x8] sm:$0xff] }
 0x60d   : > { %3363 = vmatmul.mubr.msk.f32.vlgmr.msra.gmra.mrb[10].mxu1 %vm739_vm3, %v1305_v58 }
 0x60e   : > { %3371 = vmatpush3.xpose.msk.msra.mxu1 %vm739_vm3, %v1459_v55  ;;  %3372 = vmatprep.mubr.msk.f32.mxu1 %vm3818_vm2, %v3817_v18 }
 0x60f   : > { %3385 = vmatprep.subr.mxu1 %v3817_v18 }
 0x611   : > { %3373 = vmatmul.mubr.msk.f32.vlgmr.msra.gmra.mrb[12].mxu1 %vm739_vm3, %v1457_v57 }
 0x612   : > { %3386 = vmatpush3.xpose.msk.msra.mxu1 %vm739_vm3, %v1698_v59  ;;  %3387 = vmatprep.mubr.msk.f32.mxu1 %vm3818_vm2, %v3817_v18 }
 0x613   : > { %3390 = vmatprep.subr.mxu1 %v3817_v18 }
 0x615   : > { %3388 = vmatmul.mubr.msk.f32.vlgmr.msra.gmra.mrb[14].mxu1 %vm739_vm3, %v4136_v19 }
 0x616   : > { %3391 = vmatpush3.msra.mxu1 %v1786_v60  ;;  %3392 = vmatprep.mubr.msk.f32.mxu1 %vm3818_vm2, %v3817_v18 }
 0x617   : > { %3400 = vmatprep.subr.mxu1 %v3817_v18 }
 0x6e0   : > { %v4214_v61 = vpop.f32.mrb[10].mxu1 }
 0x6e1   : > { %v3364_v62 = vpop.f32.mrb[11].mxu1 }
 0x6e4   : > { %v1530_v63 = vpop.f32.mrb[12].mxu1 }
 0x6e5   : > { %v3374_v0 = vpop.f32.mrb[13].mxu1  ;;  %v1534_v12 = vmul.f32 0.17677669, %v1530_v63 }
 0x6e7   : > { %v1535_v13 = vsel %vm739_vm3, %v1534_v12, -inf }
 0x6e8   : > { %v1769_v1 = vpop.f32.mrb[14].mxu1 }
 0x6e9   : > { %v1773_v2 = vmul.f32 0.17677669, %v1769_v1  ;;  %v3389_v3 = vpop.f32.mrb[15].mxu1 }
 0x6eb   : > { %v1774_v4 = vsel %vm739_vm3, %v1773_v2, -inf }
 0x6ec   : > { %1775 = vmax.xlane.f32.xlu0 %v1774_v4 }
 0x702   : > { %2177 = vrot.lane.b32.xlu0 %v4136_v19, %s3823_s13 }
 0x706   : > { %2175 = vrot.lane.b32.xlu0 %v4136_v19, %s3824_s19 }
 0x779   : > { %v1776_v5 = vpop.xlane.xlu0 %1775 }
 0x77a   : > { %v1777_v6 = vsub.f32 %v1773_v2, %v1776_v5  ;;  %v734_v2 = vld [vmem:[%s4081_s15 + $0x10] sm:$0xff] }
 0x77c   : > { %v1778_v7 = vmul.f32 1.442695, %v1777_v6 }
 0x77d   : > { %v2178_v23 = vpop.permute.xlu0 %2177 }
 0x77e   : > { %3616 = vpow2.f32 %v1778_v7 }
 0x781   : > { %v2176_v25 = vpop.permute.xlu0 %2175 }
 0x788   : > { %v3617_v8 = vpop.eup %3616 }
 0x789   : > { %v1780_v9 = vsel %vm739_vm3, %v3617_v8, 0.0 }
 0x78a   : > { %1781 = vadd.xlane.f32.xlu1 %v1780_v9 }
 0x79b   : > { %1935 = vrot.lane.b32.xlu1 %v4136_v19, %s3822_s20 }
 0x7bf   : > { %1056 = vmax.xlane.f32.xlu1 %v1055_v11 }
 0x7d0   : > { %1066 = vrot.lane.b32.xlu1 %v4138_v20, %s3828_s24 }
 0x7f4   : > { %1536 = vmax.xlane.f32.xlu1 %v1535_v13 }
 0x805   : > { %2265 = vrot.lane.b32.xlu1 %v4136_v19, %s3825_s30 }
 0x809   : > { %2417 = vrot.lane.b32.xlu1 %v4136_v19, %s3826_s14 }
 0x80d   : > { %2415 = vrot.lane.b32.xlu1 %v4136_v19, %s3827_s18  ;;  %s4502_s18 = sld [smem:[#allocation18_spill]] }
 0x813   : > { %p4506_p8 = scmp.ne.s32.totalorder %s4502_s18, 0 }
 0x817   : > { %v1782_v16 = vpop.xlane.xlu1 %1781 }
 0x818   : > { %3618 = vrcp.f32 %v1782_v16 }
 0x81b   : > { %v1936_v24 = vpop.permute.xlu1 %1935 }
 0x822   : > { %v3619_v21 = vpop.eup %3618 }
 0x823   : > { %v1784_v22 = vmul.f32 %v3619_v21, %v3617_v8  ;;  %v4284_v8 = vld [vmem:[%s4081_s15 + $0x18] sm:$0xff] }
 0x825   : > { %3393 = vmatmul.mubr.msk.f32.vlgmr.msra.gmra.mrb[16].mxu1 %vm739_vm3, %v1784_v22 }
 0x826   : > { %3401 = vmatpush3.xpose.msk.msra.mxu1 %vm739_vm3, %v1938_v14  ;;  %3402 = vmatprep.mubr.msk.f32.mxu1 %vm3818_vm2, %v3817_v18 }
 0x827   : > { %3415 = vmatprep.subr.mxu1 %v3817_v18 }
 0x829   : > { %3403 = vmatmul.mubr.msk.f32.vlgmr.msra.gmra.mrb[18].mxu1 %vm739_vm3, %v1936_v24 }
 0x82a   : > { %3416 = vmatpush3.xpose.msk.msra.mxu1 %vm739_vm3, %v2178_v23  ;;  %3417 = vmatprep.mubr.msk.f32.mxu1 %vm3818_vm2, %v3817_v18 }
 0x82b   : > { %3420 = vmatprep.subr.mxu1 %v3817_v18 }
 0x82d   : > { %3418 = vmatmul.mubr.msk.f32.vlgmr.msra.gmra.mrb[20].mxu1 %vm739_vm3, %v2176_v25 }
 0x82e   : > { %3422 = vmatprep.mubr.msk.f32.mxu1 %vm3818_vm2, %v3817_v18 }
 0x84c   : > { %v1057_v26 = vpop.xlane.xlu1 %1056 }
 0x84d   : > { %v1058_v27 = vsub.f32 %v1054_v10, %v1057_v26 }
 0x84f   : > { %v1059_v28 = vmul.f32 1.442695, %v1058_v27 }
 0x850   : > { %v1067_v29 = vpop.permute.xlu1 %1066 }
 0x851   : > { %3620 = vpow2.f32 %v1059_v28  ;;  %3346 = vmatpush3.msra.mxu0 %v1067_v29 }
 0x852   : > { %3350 = vmatprep.subr.mxu0 %v3817_v18 }
 0x85b   : > { %v3621_v30 = vpop.eup %3620 }
 0x85c   : > { %v1061_v31 = vsel %vm739_vm3, %v3621_v30, 0.0 }
 0x85d   : > { %1062 = vadd.xlane.f32.xlu0 %v1061_v31 }
 0x881   : > { %v1537_v32 = vpop.xlane.xlu1 %1536 }
 0x882   : > { %v1538_v35 = vsub.f32 %v1534_v12, %v1537_v32 }
 0x884   : > { %v1539_v37 = vmul.f32 1.442695, %v1538_v35 }
 0x885   : > { %v2266_v33 = vpop.permute.xlu1 %2265 }
 0x886   : > { %3421 = vmatpush3.msra.mxu1 %v2266_v33 }
 0x887   : > { %3430 = vmatprep.subr.mxu1 %v3817_v18 }
 0x889   : > { %v2418_v53 = vpop.permute.xlu1 %2417 }
 0x88d   : > { %v2416_v54 = vpop.permute.xlu1 %2415 }
 0x8ea   : > { %v1063_v34 = vpop.xlane.xlu0 %1062 }
 0x8eb   : > { %3622 = vrcp.f32 %v1063_v34 }
 0x8ec   : > { %3624 = vpow2.f32 %v1539_v37 }
 0x8f5   : > { %v3623_v36 = vpop.eup %3622 }
 0x8f6   : > { %v1065_v38 = vmul.f32 %v3623_v36, %v3621_v30  ;;  %v3625_v50 = vpop.eup %3624 }
 0x8f7   : > { %v1541_v51 = vsel %vm739_vm3, %v3625_v50, 0.0 }
 0x8f8   : > { %3348 = vmatmul.mubr.msk.f32.vlgmr.msra.gmra.mrb[2].mxu0 %vm739_vm3, %v1065_v38  ;;  %v4252_v40 = vpop.f32.mrb[16].mxu1 }
 0x8f9   : > { %v3394_v41 = vpop.f32.mrb[17].mxu1  ;;  %3352 = vmatprep.mubr.msk.f32.mxu0 %vm3818_vm2, %v3817_v18  ;;  %3351 = vmatpush3.msra.mxu0 %v4262_v52 }
 0x8fa   : > { %3365 = vmatprep.subr.mxu0 %v3817_v18 }
 0x8fc   : > { %v2009_v42 = vpop.f32.mrb[18].mxu1 }
 0x8fd   : > { %v2013_v43 = vmul.f32 0.17677669, %v2009_v42  ;;  %v3404_v44 = vpop.f32.mrb[19].mxu1 }
 0x8ff   : > { %v2014_v45 = vsel %vm739_vm3, %v2013_v43, -inf }
 0x900   : > { %2015 = vmax.xlane.f32.xlu1 %v2014_v45  ;;  %v2249_v46 = vpop.f32.mrb[20].mxu1 }
 0x901   : > { %v2253_v47 = vmul.f32 0.17677669, %v2249_v46  ;;  %v3419_v48 = vpop.f32.mrb[21].mxu1 }
 0x903   : > { %v2254_v49 = vsel %vm739_vm3, %v2253_v47, -inf }
 0x904   : > { %2255 = vmax.xlane.f32.xlu0 %v2254_v49 }
 0x908   : > { %1542 = vadd.xlane.f32.xlu0 %v1541_v51 }
 0x91e   : > { %1546 = vrot.lane.b32.xlu0 %v4138_v20, %s3829_s22 }
 0x98d   : > { %v2016_v55 = vpop.xlane.xlu1 %2015 }
 0x98e   : > { %v2017_v56 = vsub.f32 %v2013_v43, %v2016_v55 }
 0x990   : > { %v2018_v59 = vmul.f32 1.442695, %v2017_v56 }
 0x991   : > { %v2256_v57 = vpop.xlane.xlu0 %2255 }
 0x992   : > { %v2257_v58 = vsub.f32 %v2253_v47, %v2256_v57 }
 0x994   : > { %v2258_v60 = vmul.f32 1.442695, %v2257_v58 }
 0x995   : > { %v1543_v1 = vpop.xlane.xlu0 %1542 }
 0x996   : > { %3626 = vpow2.f32 %v2258_v60 }
 0x997   : > { %3628 = vpow2.f32 %v2018_v59 }
 0x998   : > { %3630 = vrcp.f32 %v1543_v1 }
 0x999   : > { %v1547_v6 = vpop.permute.xlu0 %1546 }
 0x9a0   : > { %v3627_v62 = vpop.eup %3626 }
 0x9a1   : > { %v2260_v20 = vsel %vm739_vm3, %v3627_v62, 0.0  ;;  %v3629_v63 = vpop.eup %3628 }
 0x9a2   : > { %2261 = vadd.xlane.f32.xlu0 %v2260_v20  ;;  %v2020_v0 = vsel %vm739_vm3, %v3629_v63, 0.0  ;;  %v3631_v5 = vpop.eup %3630 }
 0x9a3   : > { %v1545_v7 = vmul.f32 %v3631_v5, %v3625_v50  ;;  %v2714_v5 = vld [vmem:[%s4090_s0] sm:$0xff] }
 0x9a6   : > { %2021 = vadd.xlane.f32.xlu0 %v2020_v0  ;;  %v3224_v0 = vld [vmem:[%s4499_s12] ss:$0 sm:$0xff] }
 0x9bc   : > { %2025 = vrot.lane.b32.xlu0 %v4136_v19, %s3828_s24  ;;  %s3243_s24 = sshll.u32 %s3924_s29, 8  ;;  %s4505_s29 = sand.u32 1, %s3802_s26  }
 0x9bd   : > { %s4400_s12 = scalar_lea.sflag [#allocation5], %s4505_s29 }
 0x9cb   : > { %v1138_v3 = vpop.f32.mrb[2].mxu0 }
 0x9cc   : > { %v3349_v4 = vpop.f32.mrb[3].mxu0  ;;  %3353 = vmatmul.mubr.msk.f32.vlgmr.msra.gmra.mrb[0].mxu0 %vm739_vm3, %v1138_v3 }
 0x9cd   : > { %3366 = vmatpush3.msra.mxu0 %v734_v2  ;;  %3367 = vmatprep.mubr.msk.f32.mxu0 %vm3818_vm2, %v3817_v18 }
 0x9ce   : > { %3375 = vmatprep.subr.mxu0 %v3817_v18 }
 0x9d4   : > { %3368 = vmatmul.mubr.msk.f32.vlgmr.msra.gmra.mrb[0].mxu0 %vm739_vm3, %v4214_v61 }
 0x9d5   : > { %3376 = vmatpush3.msra.mxu0 %v1547_v6  ;;  %3377 = vmatprep.mubr.msk.f32.mxu0 %vm3818_vm2, %v3817_v18  ;;  %v2715_v6 = vld [vmem:[%s4090_s0 + $0x8] sm:$0xff] }
 0x9d6   : > { %3380 = vmatprep.subr.mxu0 %v3817_v18 }
 0x9d8   : > { %3378 = vmatmul.mubr.msk.f32.vlgmr.msra.gmra.mrb[4].mxu0 %vm739_vm3, %v1545_v7  ;;  %v2716_v7 = vld [vmem:[%s4090_s0 + $0x10] sm:$0xff] }
 0x9d9   : > { %3382 = vmatprep.mubr.msk.f32.mxu0 %vm3818_vm2, %v3817_v18  ;;  %3381 = vmatpush3.msra.mxu0 %v4284_v8 }
 0x9da   : > { %3395 = vmatprep.subr.mxu0 %v3817_v18 }
 0xa2f   : > { %v2262_v9 = vpop.xlane.xlu0 %2261 }
 0xa30   : > { %3632 = vrcp.f32 %v2262_v9  ;;  %v2717_v9 = vld [vmem:[%s4090_s0 + $0x18] sm:$0xff] }
 0xa33   : > { %v2022_v11 = vpop.xlane.xlu0 %2021 }
 0xa34   : > { %3634 = vrcp.f32 %v2022_v11  ;;  %v2809_v11 = vld [vmem:[%s4100_s21 + $0x8] sm:$0xff] }
 0xa37   : > { %v2026_v16 = vpop.permute.xlu0 %2025 }
 0xa3a   : > { %v3633_v61 = vpop.eup %3632 }
 0xa3b   : > { %v2264_v10 = vmul.f32 %v3633_v61, %v3627_v62  ;;  %v3487_v61 = vpack.c.bf16 %v2717_v9, %v2716_v7 }
 0xa3d   : > { %3423 = vmatmul.mubr.msk.f32.vlgmr.msra.gmra.mrb[22].mxu1 %vm739_vm3, %v2264_v10  ;;  %v2808_v10 = vld [vmem:[%s4100_s21] sm:$0xff] }
 0xa3e   : > { %3431 = vmatpush3.xpose.msk.msra.mxu1 %vm739_vm3, %v2418_v53  ;;  %3432 = vmatprep.mubr.msk.f32.mxu1 %vm3818_vm2, %v3817_v18  ;;  %v3635_v14 = vpop.eup %3634 }
 0xa3f   : > { %v2024_v21 = vmul.f32 %v3635_v14, %v3629_v63  ;;  %v2811_v14 = vld [vmem:[%s4100_s21 + $0x18] sm:$0xff] }
 0xa41   : > { %3433 = vmatmul.mubr.msk.f32.vlgmr.msra.gmra.mrb[24].mxu1 %vm739_vm3, %v2416_v54 }
 0xaab   : > { %v1618_v12 = vpop.f32.mrb[4].mxu0 }
 0xaac   : > { %v3379_v13 = vpop.f32.mrb[5].mxu0  ;;  %3383 = vmatmul.mubr.msk.f32.vlgmr.msra.gmra.mrb[0].mxu0 %vm739_vm3, %v1618_v12  ;;  %v2810_v12 = vld [vmem:[%s4100_s21 + $0x10] sm:$0xff] }
 0xaad   : > { %3396 = vmatpush3.msra.mxu0 %v4175_v39  ;;  %3397 = vmatprep.mubr.msk.f32.mxu0 %vm3818_vm2, %v3817_v18  ;;  %v3491_v13 = vpack.c.bf16 %v2809_v11, %v2808_v10 }
 0xaae   : > { %3405 = vmatprep.subr.mxu0 %v3817_v18 }
 0xab0   : > { %3398 = vmatmul.mubr.msk.f32.vlgmr.msra.gmra.mrb[6].mxu0 %vm739_vm3, %v4252_v40 }
 0xab1   : > { %3406 = vmatpush3.msra.mxu0 %v2026_v16  ;;  %3407 = vmatprep.mubr.msk.f32.mxu0 %vm3818_vm2, %v3817_v18  ;;  %v3495_v16 = vpack.c.bf16 %v2811_v14, %v2810_v12 }
 0xab2   : > { %3410 = vmatprep.subr.mxu0 %v3817_v18 }
 0xab4   : > { %3408 = vmatmul.mubr.msk.f32.vlgmr.msra.gmra.mrb[8].mxu0 %vm739_vm3, %v2024_v21  ;;  %v2812_v21 = vld [vmem:[%s4100_s21 + $0x20] sm:$0xff] }
 0xab5   : > { %3411 = vmatpush3.msra.mxu0 %v4262_v52  ;;  %3412 = vmatprep.mubr.msk.f32.mxu0 %vm3818_vm2, %v3817_v18 }
 0xab6   : > { %3425 = vmatprep.subr.mxu0 %v3817_v18 }
 0xb10   : > { %v2337_v39 = vpop.f32.mrb[22].mxu1 }
 0xb11   : > { %v3424_v22 = vpop.f32.mrb[23].mxu1 }
 0xb14   : > { %v2489_v23 = vpop.f32.mrb[24].mxu1 }
 0xb15   : > { %v2493_v24 = vmul.f32 0.17677669, %v2489_v23  ;;  %v3434_v25 = vpop.f32.mrb[25].mxu1 }
 0xb17   : > { %v2494_v26 = vsel %vm739_vm3, %v2493_v24, -inf }
 0xb18   : > { %2495 = vmax.xlane.f32.xlu0 %v2494_v26 }
 0xb7f   : > { %v1691_v27 = vpop.f32.mrb[0].mxu0 }
 0xb80   : > { %v3384_v28 = vpop.f32.mrb[1].mxu0  ;;  %v3507_v36 = vadd.f32 %v1691_v27, %v4122_v15 }
 0xb82   : > { %v2657_v37 = vsel %vm650_vm1, %v3507_v36, 0.0 }
 0xb87   : > { %v2097_v29 = vpop.f32.mrb[8].mxu0 }
 0xb88   : > { %v3409_v30 = vpop.f32.mrb[9].mxu0  ;;  %3413 = vmatmul.mubr.msk.f32.vlgmr.msra.gmra.mrb[6].mxu0 %vm739_vm3, %v2097_v29 }
 0xb89   : > { %3426 = vmatpush3.msra.mxu0 %v734_v2  ;;  %3427 = vmatprep.mubr.msk.f32.mxu0 %vm3818_vm2, %v3817_v18  ;;  %v3225_v2 = vld [vmem:[%s4500_s3] ss:$0 sm:$0xff]  ;;  %s3744_s3 = sshll.u32 %s3830_s2, 4  ;;  %s3745_s3 = int_to_ptr.vmem [resolvable:$false] %s3744_s3 }
 0xb8a   : > { %3435 = vmatprep.subr.mxu0 %v3817_v18  ;;  %s3746_s0 = scalar_lea.vmem %s3745_s3, 512 }
 0xb90   : > { %3428 = vmatmul.mubr.msk.f32.vlgmr.msra.gmra.mrb[6].mxu0 %vm739_vm3, %v2337_v39  ;;  %v2813_v39 = vld [vmem:[%s4100_s21 + $0x28] sm:$0xff] }
 0xb91   : > { %3437 = vmatprep.mubr.msk.f32.mxu0 %vm3818_vm2, %v3817_v18  ;;  %v3499_v22 = vpack.c.bf16 %v2813_v39, %v2812_v21 }
 0xba5   : > { %v2496_v31 = vpop.xlane.xlu0 %2495 }
 0xba6   : > { %v2497_v32 = vsub.f32 %v2493_v24, %v2496_v31 }
 0xba8   : > { %v2498_v33 = vmul.f32 1.442695, %v2497_v32 }
 0xbaa   : > { %3636 = vpow2.f32 %v2498_v33 }
 0xbb4   : > { %v3637_v34 = vpop.eup %3636 }
 0xbb5   : > { %v2500_v35 = vsel %vm739_vm3, %v3637_v34, 0.0 }
 0xbb6   : > { %2501 = vadd.xlane.f32.xlu1 %v2500_v35  ;;  %v2814_v35 = vld [vmem:[%s4100_s21 + $0x30] sm:$0xff] }
 0xbc7   : > { %2505 = vrot.lane.b32.xlu1 %v4136_v19, %s3829_s22  ;;  %s2987_s22 = sshll.u32 %s4114_s17, 4  ;;  %s4393_s22 = int_to_ptr.vmem [resolvable:$true] %s2987_s22 }
 0xbc8   : > { %s3740_s1 = scalar_lea.vmem %s4393_s22, 256  ;;  %p3747_p2 = scmp.lt.s32.totalorder %s4393_s22, %s3745_s3 }
 0xbc9   : > { %p3741_p7 = scmp.ne.s32.totalorder %s4393_s22, %s3740_s1  ;;  %p3748_p6 = scmp.lt.s32.totalorder %s3746_s0, %s3740_s1 }
 0xbcb   : > { %p3742_p12 = pnand %p3741_p7, %p4506_p8  ;;  %p3749_p9 = por %p3748_p6, %p3747_p2 }
 0xbcd   : > { %p3743_p0 = pneg %p3742_p12 }
 0xbcf   : > { %p3750_p10 = pnand %p3749_p9, %p3743_p0 }
 0xbeb   : > { %2658 = vadd.xlane.f32.xlu1 %v2657_v37 }
 0xc43   : > { %v2502_v38 = vpop.xlane.xlu1 %2501 }
 0xc44   : > { %3638 = vrcp.f32 %v2502_v38  ;;  %v3226_v38 = vld [vmem:[%s612_s28] ss:$0 sm:$0xff] }
 0xc47   : > { %v2506_v40 = vpop.permute.xlu1 %2505 }
 0xc48   : > { %3436 = vmatpush3.msra.mxu0 %v2506_v40 }
 0xc49   : > { %3440 = vmatprep.subr.mxu0 %v3817_v18 }
 0xc4e   : > { %v3639_v41 = vpop.eup %3638 }
 0xc4f   : > { %v2504_v42 = vmul.f32 %v3639_v41, %v3637_v34 }
 0xc51   : > { %3438 = vmatmul.mubr.msk.f32.vlgmr.msra.gmra.mrb[10].mxu0 %vm739_vm3, %v2504_v42 }
 0xc52   : > { %3441 = vmatpush3.msra.mxu0 %v4284_v8  ;;  %3442 = vmatprep.mubr.msk.f32.mxu0 %vm3818_vm2, %v3817_v18  ;;  %v3483_v8 = vpack.c.bf16 %v2715_v6, %v2714_v5 }
 0xc53   : > { %3492 = vmatprep.subr.bf16.mxu0 %v3491_v13 }
 0xc54   : > { %3484 = vmatprep.subr.bf16.mxu1 %v3483_v8 }
 0xc55   : > { %3486 = vmatpush3.bf16.msra.mxu1 %v3483_v8 }
 0xc56   : > { %3488 = vmatprep.subr.bf16.mxu1 %v3487_v61 }
 0xc59   : > { %3490 = vmatpush3.bf16.msra.mxu1 %v3487_v61 }
 0xc78   : > { %v2659_v43 = vpop.xlane.xlu1 %2658 }
 0xc79   : > { %v2664_v44 = vmul.f32 0.03125, %v2659_v43 }
 0xc7b   : > { %v2666_v45 = vsub.f32 %v3507_v36, %v2664_v44  ;;  %v2815_v36 = vld [vmem:[%s4100_s21 + $0x38] sm:$0xff]  ;;  %v3229_v44 = vld [vmem:[%s620_s27] ss:$0 sm:$0xff] }
 0xc7c   : > { %v3503_v37 = vpack.c.bf16 %v2815_v36, %v2814_v35 }
 0xc7d   : > { %v2668_v50 = vmul.f32 %v2666_v45, %v2666_v45 }
 0xc7f   : > { %v2670_v51 = vsel %vm650_vm1, %v2668_v50, 0.0 }
 0xd24   : > { %v2577_v19 = vpop.f32.mrb[10].mxu0 }
 0xd25   : > { %v3439_v15 = vpop.f32.mrb[11].mxu0  ;;  %3443 = vmatmul.mubr.msk.f32.vlgmr.msra.gmra.mrb[6].mxu0 %vm739_vm3, %v2577_v19 }
 0xd26   : > { %3494 = vmatpush3.bf16.msra.mxu0 %v3491_v13  ;;  %v3232_v13 = vld [vmem:[%s623_s25] ss:$0 sm:$0xff]  ;;  %s4503_s25 = sld [smem:[#allocation26_spill]] }
 0xd27   : > { %3496 = vmatprep.subr.bf16.mxu0 %v3495_v16 }
 0xd2a   : > { %3498 = vmatpush3.bf16.msra.mxu0 %v3495_v16  ;;  %v3233_v16 = vld [vmem:[%s626_s4] ss:$0 sm:$0xff] }
 0xd2b   : > { %3500 = vmatprep.subr.bf16.mxu0 %v3499_v22 }
 0xd2c   : > { %s4504_s15 = smov %s4503_s25  ;;  %s4391_s16 = scalar_lea.hbm %s4503_s25, %s3243_s24 }
 0xd2e   : > { %3502 = vmatpush3.bf16.msra.mxu0 %v3499_v22  ;;  %v2965_v22 = vld [vmem:[#allocation8] sm:$0xff] }
 0xd2f   : > { %3504 = vmatprep.subr.bf16.mxu0 %v3503_v37 }
 0xd32   : > { %3506 = vmatpush3.bf16.msra.mxu0 %v3503_v37 }
 0xdf8   : > { %v2650_v46 = vpop.f32.mrb[6].mxu0 }
 0xdf9   : > { %v3508_v47 = vadd.f32 %v2650_v46, %v4126_v17  ;;  %v3444_v48 = vpop.f32.mrb[7].mxu0 }
 0xdfb   : > { %v2660_v49 = vsel %vm650_vm1, %v3508_v47, 0.0 }
 0xdfc   : > { %2661 = vadd.xlane.f32.xlu0 %v2660_v49 }
 0xe00   : > { %2671 = vadd.xlane.f32.xlu0 %v2670_v51 }
 0xe89   : > { %v2662_v52 = vpop.xlane.xlu0 %2661 }
 0xe8a   : > { %v2665_v18 = vmul.f32 0.03125, %v2662_v52 }
 0xe8c   : > { %v2667_v53 = vsub.f32 %v3508_v47, %v2665_v18 }
 0xe8d   : > { %v2672_v54 = vpop.xlane.xlu0 %2671 }
 0xe8e   : > { %v2676_v55 = vmul.f32 0.032258064, %v2672_v54  ;;  %v2669_v56 = vmul.f32 %v2667_v53, %v2667_v53 }
 0xe90   : > { %3640 = vrsqrt.f32 %v2676_v55  ;;  %v2673_v57 = vsel %vm650_vm1, %v2669_v56, 0.0  ;;  %vm2680_vm4 = vcmp.eq.f32.partialorder %v2676_v55, inf  ;;  %v2683_v59 = vand.u32 2147483648, %v2676_v55 }
 0xe91   : > { %2674 = vadd.xlane.f32.xlu0 %v2673_v57  ;;  %vm2682_vm5 = vcmp.eq.f32.partialorder %v2676_v55, 0.0 }
 0xe9a   : > { %v3641_v17 = vpop.eup %3640 }
 0xe9b   : > { %v2679_v58 = vmul.f32 %v3641_v17, %v2676_v55 }
 0xe9d   : > { %v2681_v60 = vsel %vm2680_vm4, %v2676_v55, %v2679_v58 }
 0xe9e   : > { %v2684_v62 = vsel %vm2682_vm5, %v2683_v59, %v2681_v60 }
 0xe9f   : > { %v2692_v20 = vadd.f32 1e-06, %v2684_v62 }
 0xea1   : > { %3642 = vrcp.f32 %v2692_v20 }
 0xeab   : > { %v3643_v63 = vpop.eup %3642 }
 0xeac   : > { %v2696_v1 = vmul.f32 %v3643_v63, %v2666_v45 }
 0xeae   : > { %v2704_v3 = vmul.f32 %v3224_v0, %v2696_v1 }
 0xeb0   : > { %v4341_v4 = vadd.f32 %v3225_v2, %v2704_v3 }
 0xeb2   : > { %3453 = vmatprep.mubr.msk.f32.mxu1 %vm650_vm1, %v4341_v4 }
 0xf1e   : > { %v2675_v23 = vpop.xlane.xlu0 %2674 }
 0xf1f   : > { %v2677_v24 = vmul.f32 0.032258064, %v2675_v23 }
 0xf21   : > { %3644 = vrsqrt.f32 %v2677_v24  ;;  %vm2687_vm6 = vcmp.eq.f32.partialorder %v2677_v24, inf  ;;  %v2690_v27 = vand.u32 2147483648, %v2677_v24  ;;  %vm2689_vm7 = vcmp.eq.f32.partialorder %v2677_v24, 0.0 }
 0xf2b   : > { %v3645_v25 = vpop.eup %3644 }
 0xf2c   : > { %v2686_v26 = vmul.f32 %v3645_v25, %v2677_v24 }
 0xf2e   : > { %v2688_v28 = vsel %vm2687_vm6, %v2677_v24, %v2686_v26 }
 0xf2f   : > { %v2691_v29 = vsel %vm2689_vm7, %v2690_v27, %v2688_v28  ;;  %v2966_v27 = vld [vmem:[#allocation8 + $0x8] sm:$0xff] }
 0xf30   : > { %v2693_v30 = vadd.f32 1e-06, %v2691_v29 }
 0xf32   : > { %3646 = vrcp.f32 %v2693_v30 }
 0xf3c   : > { %v3647_v31 = vpop.eup %3646 }
 0xf3d   : > { %v2697_v32 = vmul.f32 %v3647_v31, %v2667_v53 }
 0xf3f   : > { %v2705_v33 = vmul.f32 %v3224_v0, %v2697_v32 }
 0xf41   : > { %v2713_v34 = vadd.f32 %v3225_v2, %v2705_v33 }
 0xf43   : > { %3454 = vmatmul.mubr.msk.f32.vlgmr.msra.gmra.mrb[26].mxu1 %vm650_vm1, %v2713_v34 }
0x1016   : > { %v3455_v40 = vpop.f32.mrb[26].mxu1 }
0x1017   : > { %v2803_v41 = vadd.f32 %v3455_v40, %v3226_v38  ;;  %v2797_v42 = vpop.f32.mrb[27].mxu1 }
0x1018   : > { %v2798_v19 = vadd.f32 %v3226_v38, %v2797_v42 }
0x1019   : > { %v2807_v43 = vmax.f32 %v2803_v41, 0.0 }
0x101a   : > { %v2806_v15 = vmax.f32 %v2798_v19, 0.0 }
0x101c   : > { %3472 = vmatprep.mubr.msk.f32.mxu0 %vm2823_vm8, %v2806_v15 }
0x101d   : > { %3473 = vmatmul.mubr.msk.f32.vlgmr.msra.gmra.mrb[12].mxu0 %vm2823_vm8, %v2807_v43 }
0x10f0   : > { %v3474_v45 = vpop.f32.mrb[12].mxu0 }
0x10f1   : > { %v2896_v46 = vpop.f32.mrb[13].mxu0  ;;  %v2902_v47 = vadd.f32 %v3474_v45, %v3229_v44 }
0x10f2   : > { %v2897_v48 = vadd.f32 %v3229_v44, %v2896_v46 }
0x10f3   : > { %v2906_v51 = vadd.f32 %v2902_v47, %v2713_v34 }
0x10f4   : > { %v2905_v49 = vadd.f32 %v2897_v48, %v4341_v4 }
0x10f5   : > { %v2912_v52 = vsel %vm650_vm1, %v2906_v51, 0.0 }
0x10f6   : > { %v2909_v50 = vsel %vm650_vm1, %v2905_v49, 0.0 }
0x10f7   : > { %2910 = vadd.xlane.f32.xlu0 %v2909_v50 }
0x10fb   : > { %2913 = vadd.xlane.f32.xlu0 %v2912_v52 }
0x1184   : > { %v2911_v18 = vpop.xlane.xlu0 %2910 }
0x1185   : > { %v2915_v53 = vmul.f32 0.03125, %v2911_v18 }
0x1187   : > { %v2917_v54 = vsub.f32 %v2905_v49, %v2915_v53 }
0x1188   : > { %v2914_v55 = vpop.xlane.xlu0 %2913 }
0x1189   : > { %v2916_v56 = vmul.f32 0.03125, %v2914_v55  ;;  %v2919_v57 = vmul.f32 %v2917_v54, %v2917_v54 }
0x118b   : > { %v2918_v17 = vsub.f32 %v2906_v51, %v2916_v56  ;;  %v2921_v58 = vsel %vm650_vm1, %v2919_v57, 0.0 }
0x118c   : > { %2922 = vadd.xlane.f32.xlu0 %v2921_v58 }
0x118d   : > { %v2920_v59 = vmul.f32 %v2918_v17, %v2918_v17 }
0x118f   : > { %v2924_v60 = vsel %vm650_vm1, %v2920_v59, 0.0 }
0x1190   : > { %2925 = vadd.xlane.f32.xlu0 %v2924_v60 }
0x1219   : > { %v2923_v62 = vpop.xlane.xlu0 %2922 }
0x121a   : > { %v2927_v20 = vmul.f32 0.032258064, %v2923_v62 }
0x121c   : > { %3648 = vrsqrt.f32 %v2927_v20  ;;  %vm2931_vm9 = vcmp.eq.f32.partialorder %v2927_v20, inf  ;;  %v2934_v3 = vand.u32 2147483648, %v2927_v20  ;;  %vm2933_vm10 = vcmp.eq.f32.partialorder %v2927_v20, 0.0 }
0x121d   : > { %v2926_v63 = vpop.xlane.xlu0 %2925 }
0x121e   : > { %v2928_v0 = vmul.f32 0.032258064, %v2926_v63 }
0x1220   : > { %3650 = vrsqrt.f32 %v2928_v0  ;;  %vm2938_vm11 = vcmp.eq.f32.partialorder %v2928_v0, inf  ;;  %v2941_v9 = vand.u32 2147483648, %v2928_v0  ;;  %vm2940_vm12 = vcmp.eq.f32.partialorder %v2928_v0, 0.0 }
0x1226   : > { %v3649_v1 = vpop.eup %3648 }
0x1227   : > { %v2930_v2 = vmul.f32 %v3649_v1, %v2927_v20 }
0x1229   : > { %v2932_v4 = vsel %vm2931_vm9, %v2927_v20, %v2930_v2 }
0x122a   : > { %v3651_v5 = vpop.eup %3650  ;;  %v2935_v6 = vsel %vm2933_vm10, %v2934_v3, %v2932_v4 }
0x122b   : > { %v2943_v7 = vadd.f32 1e-06, %v2935_v6  ;;  %v2937_v8 = vmul.f32 %v3651_v5, %v2928_v0 }
0x122d   : > { %3652 = vrcp.f32 %v2943_v7  ;;  %v2939_v61 = vsel %vm2938_vm11, %v2928_v0, %v2937_v8 }
0x122e   : > { %v2942_v10 = vsel %vm2940_vm12, %v2941_v9, %v2939_v61 }
0x122f   : > { %v2944_v11 = vadd.f32 1e-06, %v2942_v10 }
0x1231   : > { %3654 = vrcp.f32 %v2944_v11 }
0x1237   : > { %v3653_v12 = vpop.eup %3652 }
0x1238   : > { %v2947_v14 = vmul.f32 %v3653_v12, %v2917_v54 }
0x123a   : > { %v2955_v21 = vmul.f32 %v3232_v13, %v2947_v14 }
0x123b   : > { %v3655_v39 = vpop.eup %3654 }
0x123c   : > { %v2948_v23 = vmul.f32 %v3655_v39, %v2918_v17  ;;  %v2963_v24 = vadd.f32 %v3233_v16, %v2955_v21 }
0x123e   : > { %v2956_v25 = vmul.f32 %v3232_v13, %v2948_v23  ;;  %v2967_v26 = vmul.f32 %v2965_v22, %v2963_v24 }
0x1240   : > { %v2964_v28 = vadd.f32 %v3233_v16, %v2956_v25  ;;  %2969 = vst.msk [vmem:[#allocation2] sm:$0xff] %vm650_vm1, %v2967_v26  ;;  %2971 = vst.msk [vmem:[%s4114_s17] sm:$0xff] %vm650_vm1, %v2967_v26 }
0x1242   : > { %v2968_v29 = vmul.f32 %v2966_v27, %v2964_v28 }
0x1244   : > { %2970 = vst.msk [vmem:[#allocation2 + $0x8] sm:$0xff] %vm650_vm1, %v2968_v29  ;;  %2972 = vst.msk [vmem:[%s4114_s17 + $0x8] sm:$0xff] %vm650_vm1, %v2968_v29 }
0x1245   : > { %3753 = shalt.err (!%p3750_p10)
}
0x1246   : > { %s3754_s17 = scalar_lea.hbm %s4391_s16, 256  ;;  %s3758_s19 = scalar_lea.hbm %s4504_s15, 512 }
0x1247   : > { %p3755_p1 = scmp.ne.s32.totalorder %s4391_s16, %s3754_s17  ;;  %p3759_p11 = scmp.lt.u32.totalorder %s4391_s16, %s4504_s15 }
0x1248   : > { %p3760_p13 = scmp.lt.u32.totalorder %s3758_s19, %s3754_s17  ;;  %p3762_p7 = scmp.lt.u32.totalorder %s3754_s17, %s4391_s16 }
0x1249   : > { %p3756_p3 = pnand %p3755_p1, %p4506_p8 }
0x124a   : > { %p3761_p4 = por %p3760_p13, %p3759_p11 }
0x124b   : > { %p3757_p5 = pneg %p3756_p3 }
0x124c   : > { %p3763_p12 = por %p3762_p7, %p3761_p4 }
0x124e   : > { %p3764_p0 = pnand %p3763_p12, %p3757_p5 }
0x1250   : > { %3767 = shalt.err (!%p3764_p0)
}
0x1251   : > { %s3831_s27 = smov 128   ;;  %s3832_s30 = smov 8  }
0x1252   : > { %3533 = dma.vmem_to_hbm [thread:$0]  (%p4506_p8), %s4393_s22, 256, %s4391_s16, %s4400_s12, %s3831_s27, %s3831_s27, %s3832_s30  }
0x1253 PF: > { %s4507_s14 = sld [smem:[#allocation15_spill]]  ;;  %s4508_s24 = sld [smem:[#allocation13_spill]] }
0x1254   : > { %s4509_s23 = sld [smem:[#allocation19_spill]] }
0x1259   : > { %p3555_p2 = scmp.ge.s32.totalorder %s4507_s14, 2  ;;  %s3002_s4 = sand.u32 1, %s4508_s24  }
0x125a   : > { %p4510_p6 = scmp.ne.s32.totalorder %s4509_s23, 0  ;;  %s3003_s25 = scalar_lea.sflag [#allocation5], %s3002_s4 }
0x125c   : > { %p3546_p9 = pnand %p3555_p2, %p4510_p6 }
0x125e   : > { %3793 = dma.done.wait (!%p3546_p9), %s3003_s25, 256  }
0x125f   : > { %3795 = vsyncadd (!%p3546_p9), %s3003_s25, 4294967040  ;;  %s4511_s28 = sld [smem:[#allocation16_spill]]  ;;  %s4512_s29 = sld [smem:[#allocation14_spill]] }
0x1260   : > { %s4513_s27 = sld [smem:[#allocation17_spill]]  ;;  %s4514_s25 = smov %s3802_s26 }
0x1265   : > { %p25_p10 = scmp.ge.s32.totalorder %s4511_s28, 4   ;;  %s4515_s26 = smov %s4512_s29 }
0x1267   :  { %27 = sbr.rel (!%p25_p10) target bundleno = 13 (0xd), region = 151 }
0x126e   :  { %3008 = vsyncpa [#allocation4], 1 }
0x126f   :  { %3010 = vsyncpa [#allocation4 + $0x1], 1 }
0x1270   :  { %3011 = vsyncpa [#allocation7], 1 }
0x1271   :  { %3012 = vsyncpa [#allocation5], 1 }
0x1272   :  { %3014 = vsyncpa [#allocation5 + $0x1], 1 }

</bundles_post_ra>
